<compile_context>
chip_gen: v6e
topology: v6e:2x2x1
jax: 0.10.0
libtpu: 0.0.40
codegen_flags: <defaults>
</compile_context>

<pallas_src>
import functools

import numpy as np
import jax
import jax.numpy as jnp
from jax import lax
from jax.experimental import pallas as pl
from jax.experimental.pallas import tpu as pltpu

EPS = 1e-5


def _ln(x, g, b):
    """LayerNorm over last axis (biased variance, eps=1e-5), PyTorch semantics."""
    mu = jnp.mean(x, axis=-1, keepdims=True)
    var = jnp.mean((x - mu) ** 2, axis=-1, keepdims=True)
    return (x - mu) * lax.rsqrt(var + EPS) * g + b


def _vmem_budget():
    """Per-generation VMEM budget: ~3/4 of physical (48 MiB v7x, 96 MiB v5e/v6e)."""
    try:
        cap = int(pltpu.get_tpu_info().vmem_capacity_bytes)
    except Exception:  # pragma: no cover - fallback when the query is unavailable
        cap = 128 * 1024 * 1024
    return int(cap * 3 // 4)


def _pick_tile(n, max_tile):
    """Largest row tile (multiple of 8) that divides n; fall back to full n."""
    for t in (1024, 512, 256, 128, 64, 32, 16, 8):
        if t <= max_tile and t <= n and n % t == 0:
            return t
    return n


def _const_specs(params, grid_ndim):
    """Full-array, grid-invariant BlockSpecs (same block for every grid step)."""
    def mk(nd):
        if grid_ndim == 1:
            return lambda i, _nd=nd: (0,) * _nd
        return lambda i, j, _nd=nd: (0,) * _nd
    return [pl.BlockSpec(p.shape, mk(p.ndim)) for p in params]


# ----------------------------------------------------------------------------
# Kernel A: residual + MultiheadAttention(LayerNorm(x))
# Flash-style: grid (batch, kv_tile), online softmax with m/l/acc scratch.
# ----------------------------------------------------------------------------
def _attn_flash_kernel(num_heads, xq_ref, xkv_ref, g1, b1, wq, bq, wkv, bkv,
                       wo_h, bo, o_ref, q_scr, m_scr, l_scr, acc_scr):
    k_idx = pl.program_id(1)
    S, D = xq_ref.shape[1], xq_ref.shape[2]
    H = num_heads
    hd = D // H

    @pl.when(k_idx == 0)
    def _init():
        xln = _ln(xq_ref[0], g1[...], b1[...]).astype(jnp.bfloat16)
        # Single MXU-wide (S,D)@(D,D) Q projection; 1/sqrt(hd) folded into wq/bq.
        q = jnp.dot(xln, wq[...], preferred_element_type=jnp.float32) + bq[...]
        q_scr[...] = q.astype(jnp.bfloat16)
        m_scr[...] = jnp.full((S, H), -jnp.inf, jnp.float32)
        l_scr[...] = jnp.zeros((S, H), jnp.float32)
        acc_scr[...] = jnp.zeros((S, D), jnp.float32)

    # K/V projection for this kv tile: one (tk,D)@(D,2D) matmul.
    kv_ln = _ln(xkv_ref[0], g1[...], b1[...]).astype(jnp.bfloat16)
    kv = jnp.dot(kv_ln, wkv[...], preferred_element_type=jnp.float32) + bkv[...]

    # Online-softmax update, one head at a time (2-D MXU ops only; scores are
    # (S, tk) per head, never the full (H, S, S) tensor).
    for h in range(H):
        sl = slice(h * hd, (h + 1) * hd)
        q_h = q_scr[:, sl]                                            # (S, hd) bf16
        k_h = kv[:, sl].astype(jnp.bfloat16)                          # (tk, hd)
        v_h = kv[:, D + h * hd:D + (h + 1) * hd].astype(jnp.bfloat16)  # (tk, hd)
        s_h = jnp.dot(q_h, k_h.T, preferred_element_type=jnp.float32)  # (S, tk)
        m_prev = m_scr[:, h:h + 1]
        m_new = jnp.maximum(m_prev, jnp.max(s_h, axis=-1, keepdims=True))
        alpha = jnp.exp(m_prev - m_new)
        p = jnp.exp(s_h - m_new)
        l_scr[:, h:h + 1] = alpha * l_scr[:, h:h + 1] + jnp.sum(p, axis=-1, keepdims=True)
        acc_scr[:, sl] = alpha * acc_scr[:, sl] + jnp.dot(
            p.astype(jnp.bfloat16), v_h, preferred_element_type=jnp.float32)
        m_scr[:, h:h + 1] = m_new

    @pl.when(k_idx == pl.num_programs(1) - 1)
    def _final():
        # Per-head output projection accumulated into ONE f32 (S, D) buffer.
        out = jnp.zeros((S, D), jnp.float32)
        for h in range(H):
            sl = slice(h * hd, (h + 1) * hd)
            o_h = (acc_scr[:, sl] *
                   pl.reciprocal(l_scr[:, h:h + 1], approx=True)).astype(jnp.bfloat16)
            out = out + jnp.dot(o_h, wo_h[h], preferred_element_type=jnp.float32)
        o_ref[0] = xq_ref[0] + out + bo[...]            # residual add (f32)


def attn_block(x_bsd, g1, b1, wq, bq, wkv, bkv, wo_h, bo, num_heads, max_kv_tile=512):
    B, S, D = x_bsd.shape
    H = num_heads
    tk = _pick_tile(S, max_kv_tile)
    params = (g1, b1, wq, bq, wkv, bkv, wo_h, bo)
    kern = functools.partial(_attn_flash_kernel, H)
    return pl.pallas_call(
        kern,
        out_shape=jax.ShapeDtypeStruct((B, S, D), jnp.float32),
        grid=(B, S // tk),
        in_specs=[pl.BlockSpec((1, S, D), lambda b, k: (b, 0, 0)),   # q / residual side
                  pl.BlockSpec((1, tk, D), lambda b, k: (b, k, 0))]  # kv tile
                 + _const_specs(params, 2),
        out_specs=pl.BlockSpec((1, S, D), lambda b, k: (b, 0, 0)),
        scratch_shapes=[pltpu.VMEM((S, D), jnp.bfloat16),            # q
                        pltpu.VMEM((S, H), jnp.float32),             # m
                        pltpu.VMEM((S, H), jnp.float32),             # l
                        pltpu.VMEM((S, D), jnp.float32)],            # acc
        compiler_params=pltpu.CompilerParams(
            dimension_semantics=("parallel", "arbitrary"),
            vmem_limit_bytes=_vmem_budget()),
    )(x_bsd, x_bsd, *params)


# ----------------------------------------------------------------------------
# Kernel B: residual + FFN(LayerNorm(x)) on flattened tokens, budget-driven tile
# ----------------------------------------------------------------------------
def _ff_block_kernel(x_ref, g2, b2, w1t, bf1, w2t, bf2, o_ref):
    xb = x_ref[...]                                 # (tile_m, D) f32
    xln = _ln(xb, g2[...], b2[...]).astype(jnp.bfloat16)
    h = jnp.dot(xln, w1t[...], preferred_element_type=jnp.float32) + bf1[...]
    h = jnp.maximum(h, 0.0).astype(jnp.bfloat16)
    y = jnp.dot(h, w2t[...], preferred_element_type=jnp.float32) + bf2[...]
    o_ref[...] = xb + y                             # residual add (f32)


def ff_block(x2d, g2, b2, w1t, bf1, w2t, bf2):
    N, D = x2d.shape
    F = w1t.shape[-1]
    budget = _vmem_budget()
    # Rough per-row live bytes: double-buffered f32 in/out + bf16 LN copy
    # + f32 and bf16 hidden activations.  Resident bf16 weights (worst case
    # double-buffered) are taken off the budget first.
    weight_bytes = 2 * 2 * (D * F + F * D)
    row_bytes = 8 * D + 8 * D + 2 * D + 4 * F + 2 * F
    avail = max(budget - weight_bytes, budget // 8)
    tile_m = _pick_tile(N, max(8, avail // row_bytes))
    params = (g2, b2, w1t, bf1, w2t, bf2)
    return pl.pallas_call(
        _ff_block_kernel,
        out_shape=jax.ShapeDtypeStruct((N, D), jnp.float32),
        grid=(N // tile_m,),
        in_specs=[pl.BlockSpec((tile_m, D), lambda i: (i, 0))] + _const_specs(params, 1),
        out_specs=pl.BlockSpec((tile_m, D), lambda i: (i, 0)),
        compiler_params=pltpu.CompilerParams(
            dimension_semantics=("parallel",), vmem_limit_bytes=budget),
    )(x2d, *params)


# ----------------------------------------------------------------------------
# Kernel C: LayerNorm4( Conv1d(ReLU(Conv1d(LayerNorm3(x)))) + x )
# Conv length axis = L (the original batch axis B), conv batch axis = S (tiled).
# Each Conv1d(k=3, pad=1) accumulates 3 tap matmuls into one f32 buffer; the tap
# shifts are applied to the narrow bf16 input, not the wide f32 output.
# ----------------------------------------------------------------------------
def _shift_fwd(m):
    """out[l] = m[l-1]; out[0] = 0 (left-padding tap)."""
    if m.shape[0] == 1:
        return jnp.zeros_like(m)
    return jnp.concatenate([jnp.zeros_like(m[:1]), m[:-1]], axis=0)


def _shift_bwd(m):
    """out[l] = m[l+1]; out[L-1] = 0 (right-padding tap)."""
    if m.shape[0] == 1:
        return jnp.zeros_like(m)
    return jnp.concatenate([m[1:], jnp.zeros_like(m[:1])], axis=0)


def _conv_block_kernel(x_ref, g3, b3, w1, bc1, w2, bc2, g4, b4, o_ref):
    xt = x_ref[...]                                 # (L, tile_S, D) f32
    L, tS, D = xt.shape

    def conv3(inp, w_ref, b_ref):
        """Conv1d(k=3, pad=1) over axis 0; inp bf16, single f32 accumulator."""
        cin = inp.shape[-1]
        cout = w_ref.shape[-1]
        y = jnp.dot(inp.reshape(L * tS, cin), w_ref[1],
                    preferred_element_type=jnp.float32).reshape(L, tS, cout) + b_ref[...]
        y = y + jnp.dot(_shift_fwd(inp).reshape(L * tS, cin), w_ref[0],
                        preferred_element_type=jnp.float32).reshape(L, tS, cout)
        y = y + jnp.dot(_shift_bwd(inp).reshape(L * tS, cin), w_ref[2],
                        preferred_element_type=jnp.float32).reshape(L, tS, cout)
        return y

    z = _ln(xt, g3[...], b3[...]).astype(jnp.bfloat16)
    y1 = jnp.maximum(conv3(z, w1, bc1), 0.0).astype(jnp.bfloat16)
    y2 = conv3(y1, w2, bc2)
    o_ref[...] = _ln(y2 + xt, g4[...], b4[...])     # residual add + LayerNorm4


def conv_block(xt, g3, b3, c1w_t, c1b, c2w_t, c2b, g4, b4):
    L, S, D = xt.shape
    C1 = c1w_t.shape[-1]
    budget = _vmem_budget()
    weight_bytes = 2 * 2 * 3 * (D * C1 + C1 * D)
    # Per tile_s "column": double-buffered f32 in/out + bf16 z (+2 shifted copies)
    # + f32 conv1 accumulator + bf16 y1 (+2 shifted copies) + f32 y2.
    col_bytes = L * (8 * D + 8 * D + 6 * D + 4 * C1 + 6 * C1 + 4 * D)
    avail = max(budget - weight_bytes, budget // 8)
    tile_s = _pick_tile(S, max(8, avail // col_bytes))
    params = (g3, b3, c1w_t, c1b, c2w_t, c2b, g4, b4)
    return pl.pallas_call(
        _conv_block_kernel,
        out_shape=jax.ShapeDtypeStruct((L, S, D), jnp.float32),
        grid=(S // tile_s,),
        in_specs=[pl.BlockSpec((L, tile_s, D), lambda i: (0, i, 0))] + _const_specs(params, 1),
        out_specs=pl.BlockSpec((L, tile_s, D), lambda i: (0, i, 0)),
        compiler_params=pltpu.CompilerParams(
            dimension_semantics=("parallel",), vmem_limit_bytes=budget),
    )(xt, *params)


# ----------------------------------------------------------------------------
# Full block forward: single (B, S, D) layout, one transpose in / one out.
# ----------------------------------------------------------------------------
def conformer_block_forward(x, p, num_heads):
    S, B, D = x.shape
    xb = jnp.transpose(x, (1, 0, 2))                # (B, S, D)

    # 1) x = x + MHA(LN1(x))
    xb = attn_block(xb, p["ln1_g"], p["ln1_b"], p["wq"], p["bq"], p["wkv"],
                    p["bkv"], p["wo_h"], p["bo"], num_heads)

    # 2) x = x + FFN(LN2(x))   (token-pointwise -> free flatten to (B*S, D))
    xb = ff_block(xb.reshape(B * S, D), p["ln2_g"], p["ln2_b"],
                  p["w1_t"], p["bf1"], p["w2_t"], p["bf2"]).reshape(B, S, D)

    # 3) x = LN4(Conv(LN3(x)) + x); conv length axis is B, batch axis is S,
    #    which is exactly the (B, S, D) layout -> no extra transpose needed.
    yb = conv_block(xb, p["ln3_g"], p["ln3_b"], p["c1w_t"], p["c1b"],
                    p["c2w_t"], p["c2b"], p["ln4_g"], p["ln4_b"])
    return jnp.transpose(yb, (1, 0, 2))             # back to (S, B, D)


# ----------------------------------------------------------------------------
# Parameters (deterministic, PyTorch-shaped "raw" + kernel-ready "prep")
# ----------------------------------------------------------------------------
def init_params(key, dim, num_heads, ff_expansion=4, conv_expansion=2):
    D, F, C = dim, dim * ff_expansion, dim * conv_expansion
    H, hd = num_heads, dim // num_heads
    keys = jax.random.split(key, 24)
    it = iter(keys)

    def nrm(shape, scale=0.05):
        return (scale * jax.random.normal(next(it), shape)).astype(jnp.float32)

    raw = {}
    for i in (1, 2, 3, 4):
        raw[f"ln{i}_g"] = (1.0 + 0.1 * jax.random.normal(next(it), (D,))).astype(jnp.float32)
        raw[f"ln{i}_b"] = nrm((D,), 0.1)
    raw["in_proj_w"] = nrm((3 * D, D))
    raw["in_proj_b"] = nrm((3 * D,))
    raw["out_proj_w"] = nrm((D, D))
    raw["out_proj_b"] = nrm((D,))
    raw["ff_w1"] = nrm((F, D))
    raw["ff_b1"] = nrm((F,))
    raw["ff_w2"] = nrm((D, F))
    raw["ff_b2"] = nrm((D,))
    raw["conv1_w"] = nrm((C, D, 3))
    raw["conv1_b"] = nrm((C,))
    raw["conv2_w"] = nrm((D, C, 3))
    raw["conv2_b"] = nrm((D,))

    bf16 = jnp.bfloat16
    prep = {}
    for i in (1, 2, 3, 4):
        prep[f"ln{i}_g"] = raw[f"ln{i}_g"].reshape(1, D)
        prep[f"ln{i}_b"] = raw[f"ln{i}_b"].reshape(1, D)

    # MHA weights: pre-transposed 2-D projections (bf16 MXU operands).
    # 1/sqrt(hd) folded into the Q weights/bias at prep time.
    W, bqkv = raw["in_proj_w"], raw["in_proj_b"]
    scale = 1.0 / float(np.sqrt(hd))
    prep["wq"] = (W[:D].T * scale).astype(bf16)                      # (D, D)
    prep["bq"] = (bqkv[:D] * scale).reshape(1, D)                    # (1, D) f32
    prep["wkv"] = jnp.concatenate([W[D:2 * D].T, W[2 * D:].T], axis=1).astype(bf16)  # (D, 2D)
    prep["bkv"] = bqkv[D:].reshape(1, 2 * D)                         # (1, 2D) f32
    prep["wo_h"] = raw["out_proj_w"].T.reshape(H, hd, D).astype(bf16)  # (H, hd, D)
    prep["bo"] = raw["out_proj_b"].reshape(1, D)

    prep["w1_t"] = raw["ff_w1"].T.astype(bf16)                       # (D, F)
    prep["bf1"] = raw["ff_b1"].reshape(1, F)
    prep["w2_t"] = raw["ff_w2"].T.astype(bf16)                       # (F, D)
    prep["bf2"] = raw["ff_b2"].reshape(1, D)
    prep["c1w_t"] = jnp.transpose(raw["conv1_w"], (2, 1, 0)).astype(bf16)  # (3, Cin, Cout)
    prep["c1b"] = raw["conv1_b"].reshape(1, C)
    prep["c2w_t"] = jnp.transpose(raw["conv2_w"], (2, 1, 0)).astype(bf16)
    prep["c2b"] = raw["conv2_b"].reshape(1, D)
    return raw, prep


# ----------------------------------------------------------------------------
# Pure-JAX reference (mirrors the PyTorch module in eval mode), f32 throughout
# ----------------------------------------------------------------------------
def reference_forward(x, r, num_heads):
    S, B, D = x.shape
    hd = D // num_heads

    res = x
    xl = _ln(x, r["ln1_g"], r["ln1_b"])
    qkv = xl @ r["in_proj_w"].T + r["in_proj_b"]
    q, k, v = jnp.split(qkv, 3, axis=-1)
    qh = q.reshape(S, B, num_heads, hd)
    kh = k.reshape(S, B, num_heads, hd)
    vh = v.reshape(S, B, num_heads, hd)
    s = jnp.einsum("sbhd,tbhd->bhst", qh, kh) / jnp.sqrt(hd)
    p = jax.nn.softmax(s, axis=-1)
    o = jnp.einsum("bhst,tbhd->sbhd", p, vh).reshape(S, B, D)
    x = res + (o @ r["out_proj_w"].T + r["out_proj_b"])

    res = x
    xl = _ln(x, r["ln2_g"], r["ln2_b"])
    y = jnp.maximum(xl @ r["ff_w1"].T + r["ff_b1"], 0.0) @ r["ff_w2"].T + r["ff_b2"]
    x = res + y

    res = x
    z = _ln(x, r["ln3_g"], r["ln3_b"])

    def conv1d(zin, w, b):            # zin: (S, L, Cin) channels-last, conv over L
        L = zin.shape[1]
        zp = jnp.pad(zin, ((0, 0), (1, 1), (0, 0)))
        wt = jnp.transpose(w, (2, 1, 0))
        return b + sum(
            jnp.einsum("slc,cf->slf", zp[:, kk:kk + L, :], wt[kk]) for kk in range(3)
        )

    y1 = jnp.maximum(conv1d(z, r["conv1_w"], r["conv1_b"]), 0.0)
    y2 = conv1d(y1, r["conv2_w"], r["conv2_b"])
    return _ln(y2 + res, r["ln4_g"], r["ln4_b"])


if __name__ == "__main__":
    S, B, D, H = 8, 2, 32, 4          # seq, batch, dim, num_heads
    key = jax.random.PRNGKey(0)
    k_x, k_p = jax.random.split(key)
    x = jax.random.normal(k_x, (S, B, D), jnp.float32)
    raw, prep = init_params(k_p, D, H)

    fwd = jax.jit(functools.partial(conformer_block_forward, num_heads=H))
    out = jax.block_until_ready(fwd(x, prep))

    ref = reference_forward(x, raw, H)
    np.testing.assert_allclose(np.asarray(out), np.asarray(ref), atol=3e-2, rtol=3e-2)
    print("KERNEL_OK")
</pallas_src>

<mosaic_0001>
module attributes {stable_mosaic.version = 11 : i64} {
  func.func @_ff_block_kernel(%arg0: i32, %arg1: memref<16x32xf32, #tpu.memory_space<vmem>>, %arg2: memref<1x32xf32, #tpu.memory_space<vmem>>, %arg3: memref<1x32xf32, #tpu.memory_space<vmem>>, %arg4: memref<32x128xbf16, #tpu.memory_space<vmem>>, %arg5: memref<1x128xf32, #tpu.memory_space<vmem>>, %arg6: memref<128x32xbf16, #tpu.memory_space<vmem>>, %arg7: memref<1x32xf32, #tpu.memory_space<vmem>>, %arg8: memref<16x32xf32, #tpu.memory_space<vmem>>) attributes {dimension_semantics = [#tpu.dimension_semantics<parallel>], iteration_bounds = array<i64: 1>, scalar_prefetch = 0 : i64, scratch_operands = 0 : i64, tpu.core_type = #tpu.core_type<tc>, window_params = [{transform_indices = @transform_0, window_bounds = array<i64: 16, 32>}, {pipeline_mode = #tpu.pipeline_mode<synchronous>, transform_indices = @transform_1, window_bounds = array<i64: 1, 32>}, {pipeline_mode = #tpu.pipeline_mode<synchronous>, transform_indices = @transform_2, window_bounds = array<i64: 1, 32>}, {pipeline_mode = #tpu.pipeline_mode<synchronous>, transform_indices = @transform_3, window_bounds = array<i64: 32, 128>}, {pipeline_mode = #tpu.pipeline_mode<synchronous>, transform_indices = @transform_4, window_bounds = array<i64: 1, 128>}, {pipeline_mode = #tpu.pipeline_mode<synchronous>, transform_indices = @transform_5, window_bounds = array<i64: 128, 32>}, {pipeline_mode = #tpu.pipeline_mode<synchronous>, transform_indices = @transform_6, window_bounds = array<i64: 1, 32>}, {transform_indices = @transform_7, window_bounds = array<i64: 16, 32>}]} {
    %c0 = arith.constant 0 : index
    %c0_0 = arith.constant 0 : index
    %0 = vector.load %arg1[%c0, %c0_0] : memref<16x32xf32, #tpu.memory_space<vmem>>, vector<16x32xf32>
    %c0_1 = arith.constant 0 : index
    %c0_2 = arith.constant 0 : index
    %1 = vector.load %arg2[%c0_1, %c0_2] : memref<1x32xf32, #tpu.memory_space<vmem>>, vector<1x32xf32>
    %c0_3 = arith.constant 0 : index
    %c0_4 = arith.constant 0 : index
    %2 = vector.load %arg3[%c0_3, %c0_4] : memref<1x32xf32, #tpu.memory_space<vmem>>, vector<1x32xf32>
    %cst = arith.constant dense<0.000000e+00> : vector<16xf32>
    %3 = vector.multi_reduction <add>, %0, %cst [1] : vector<16x32xf32> to vector<16xf32>
    %4 = vector.shape_cast %3 : vector<16xf32> to vector<16x1xf32>
    %cst_5 = arith.constant 3.200000e+01 : f32
    %5 = vector.broadcast %cst_5 : f32 to vector<16x1xf32>
    %6 = arith.divf %4, %5 : vector<16x1xf32>
    %7 = vector.broadcast %6 : vector<16x1xf32> to vector<16x32xf32>
    %8 = arith.subf %0, %7 : vector<16x32xf32>
    %9 = arith.mulf %8, %8 : vector<16x32xf32>
    %cst_6 = arith.constant dense<0.000000e+00> : vector<16xf32>
    %10 = vector.multi_reduction <add>, %9, %cst_6 [1] : vector<16x32xf32> to vector<16xf32>
    %11 = vector.shape_cast %10 : vector<16xf32> to vector<16x1xf32>
    %cst_7 = arith.constant 3.200000e+01 : f32
    %12 = vector.broadcast %cst_7 : f32 to vector<16x1xf32>
    %13 = arith.divf %11, %12 : vector<16x1xf32>
    %14 = vector.broadcast %6 : vector<16x1xf32> to vector<16x32xf32>
    %15 = arith.subf %0, %14 : vector<16x32xf32>
    %cst_8 = arith.constant 9.99999974E-6 : f32
    %16 = vector.broadcast %cst_8 : f32 to vector<16x1xf32>
    %17 = arith.addf %13, %16 : vector<16x1xf32>
    %18 = math.rsqrt %17 : vector<16x1xf32>
    %19 = vector.broadcast %18 : vector<16x1xf32> to vector<16x32xf32>
    %20 = arith.mulf %15, %19 : vector<16x32xf32>
    %21 = vector.broadcast %1 : vector<1x32xf32> to vector<16x32xf32>
    %22 = arith.mulf %20, %21 : vector<16x32xf32>
    %23 = vector.broadcast %2 : vector<1x32xf32> to vector<16x32xf32>
    %24 = arith.addf %22, %23 : vector<16x32xf32>
    %25 = arith.truncf %24 : vector<16x32xf32> to vector<16x32xbf16>
    %c0_9 = arith.constant 0 : index
    %c0_10 = arith.constant 0 : index
    %26 = vector.load %arg4[%c0_9, %c0_10] : memref<32x128xbf16, #tpu.memory_space<vmem>>, vector<32x128xbf16>
    %cst_11 = arith.constant dense<0.000000e+00> : vector<16x128xf32>
    %27 = tpu.matmul %25, %26, %cst_11 {dimension_numbers = #tpu.dot_dimension_numbers<[1], [0], [0], [1], [0, 0, 1, 1], [], []>} : vector<16x32xbf16>, vector<32x128xbf16>, vector<16x128xf32> -> vector<16x128xf32>
    %c0_12 = arith.constant 0 : index
    %c0_13 = arith.constant 0 : index
    %28 = vector.load %arg5[%c0_12, %c0_13] : memref<1x128xf32, #tpu.memory_space<vmem>>, vector<1x128xf32>
    %29 = vector.broadcast %28 : vector<1x128xf32> to vector<16x128xf32>
    %30 = arith.addf %27, %29 : vector<16x128xf32>
    %cst_14 = arith.constant 0.000000e+00 : f32
    %31 = vector.broadcast %cst_14 : f32 to vector<16x128xf32>
    %32 = arith.maximumf %30, %31 : vector<16x128xf32>
    %33 = arith.truncf %32 : vector<16x128xf32> to vector<16x128xbf16>
    %c0_15 = arith.constant 0 : index
    %c0_16 = arith.constant 0 : index
    %34 = vector.load %arg6[%c0_15, %c0_16] : memref<128x32xbf16, #tpu.memory_space<vmem>>, vector<128x32xbf16>
    %cst_17 = arith.constant dense<0.000000e+00> : vector<16x32xf32>
    %35 = tpu.matmul %33, %34, %cst_17 {dimension_numbers = #tpu.dot_dimension_numbers<[1], [0], [0], [1], [0, 0, 1, 1], [], []>} : vector<16x128xbf16>, vector<128x32xbf16>, vector<16x32xf32> -> vector<16x32xf32>
    %c0_18 = arith.constant 0 : index
    %c0_19 = arith.constant 0 : index
    %36 = vector.load %arg7[%c0_18, %c0_19] : memref<1x32xf32, #tpu.memory_space<vmem>>, vector<1x32xf32>
    %37 = vector.broadcast %36 : vector<1x32xf32> to vector<16x32xf32>
    %38 = arith.addf %35, %37 : vector<16x32xf32>
    %39 = arith.addf %0, %38 : vector<16x32xf32>
    %c0_20 = arith.constant 0 : index
    %c0_21 = arith.constant 0 : index
    %40 = vector.load %arg8[%c0_20, %c0_21] : memref<16x32xf32, #tpu.memory_space<vmem>>, vector<16x32xf32>
    tpu.vector_store %arg8[%c0_20, %c0_21], %39 {strides = array<i32>} : memref<16x32xf32, #tpu.memory_space<vmem>>, vector<16x32xf32>,
    return
  }
  func.func @transform_0(%arg0: i32) -> (i32, i32) {
    %c0_i32 = arith.constant 0 : i32
    %c0_i32_0 = arith.constant 0 : i32
    return %arg0, %c0_i32 : i32, i32
  }
  func.func @transform_1(%arg0: i32) -> (i32, i32) {
    %c0_i32 = arith.constant 0 : i32
    %c0_i32_0 = arith.constant 0 : i32
    %c0_i32_1 = arith.constant 0 : i32
    return %c0_i32, %c0_i32_0 : i32, i32
  }
  func.func @transform_2(%arg0: i32) -> (i32, i32) {
    %c0_i32 = arith.constant 0 : i32
    %c0_i32_0 = arith.constant 0 : i32
    %c0_i32_1 = arith.constant 0 : i32
    return %c0_i32, %c0_i32_0 : i32, i32
  }
  func.func @transform_3(%arg0: i32) -> (i32, i32) {
    %c0_i32 = arith.constant 0 : i32
    %c0_i32_0 = arith.constant 0 : i32
    %c0_i32_1 = arith.constant 0 : i32
    return %c0_i32, %c0_i32_0 : i32, i32
  }
  func.func @transform_4(%arg0: i32) -> (i32, i32) {
    %c0_i32 = arith.constant 0 : i32
    %c0_i32_0 = arith.constant 0 : i32
    %c0_i32_1 = arith.constant 0 : i32
    return %c0_i32, %c0_i32_0 : i32, i32
  }
  func.func @transform_5(%arg0: i32) -> (i32, i32) {
    %c0_i32 = arith.constant 0 : i32
    %c0_i32_0 = arith.constant 0 : i32
    %c0_i32_1 = arith.constant 0 : i32
    return %c0_i32, %c0_i32_0 : i32, i32
  }
  func.func @transform_6(%arg0: i32) -> (i32, i32) {
    %c0_i32 = arith.constant 0 : i32
    %c0_i32_0 = arith.constant 0 : i32
    %c0_i32_1 = arith.constant 0 : i32
    return %c0_i32, %c0_i32_0 : i32, i32
  }
  func.func @transform_7(%arg0: i32) -> (i32, i32) {
    %c0_i32 = arith.constant 0 : i32
    %c0_i32_0 = arith.constant 0 : i32
    return %arg0, %c0_i32 : i32, i32
  }
}

module attributes {stable_mosaic.version = 11 : i64} {
  func.func @_attn_flash_kernel(%arg0: i32, %arg1: i32, %arg2: memref<1x8x32xf32, #tpu.memory_space<vmem>>, %arg3: memref<1x8x32xf32, #tpu.memory_space<vmem>>, %arg4: memref<1x32xf32, #tpu.memory_space<vmem>>, %arg5: memref<1x32xf32, #tpu.memory_space<vmem>>, %arg6: memref<32x32xbf16, #tpu.memory_space<vmem>>, %arg7: memref<1x32xf32, #tpu.memory_space<vmem>>, %arg8: memref<32x64xbf16, #tpu.memory_space<vmem>>, %arg9: memref<1x64xf32, #tpu.memory_space<vmem>>, %arg10: memref<4x8x32xbf16, #tpu.memory_space<vmem>>, %arg11: memref<1x32xf32, #tpu.memory_space<vmem>>, %arg12: memref<1x8x32xf32, #tpu.memory_space<vmem>>, %arg13: memref<8x32xbf16, #tpu.memory_space<vmem>>, %arg14: memref<8x4xf32, #tpu.memory_space<vmem>>, %arg15: memref<8x4xf32, #tpu.memory_space<vmem>>, %arg16: memref<8x32xf32, #tpu.memory_space<vmem>>) attributes {dimension_semantics = [#tpu.dimension_semantics<parallel>, #tpu.dimension_semantics<arbitrary>], iteration_bounds = array<i64: 2, 1>, scalar_prefetch = 0 : i64, scratch_operands = 4 : i64, tpu.core_type = #tpu.core_type<tc>, window_params = [{transform_indices = @transform_0, window_bounds = array<i64: 1, 8, 32>}, {transform_indices = @transform_1, window_bounds = array<i64: 1, 8, 32>}, {pipeline_mode = #tpu.pipeline_mode<synchronous>, transform_indices = @transform_2, window_bounds = array<i64: 1, 32>}, {pipeline_mode = #tpu.pipeline_mode<synchronous>, transform_indices = @transform_3, window_bounds = array<i64: 1, 32>}, {pipeline_mode = #tpu.pipeline_mode<synchronous>, transform_indices = @transform_4, window_bounds = array<i64: 32, 32>}, {pipeline_mode = #tpu.pipeline_mode<synchronous>, transform_indices = @transform_5, window_bounds = array<i64: 1, 32>}, {pipeline_mode = #tpu.pipeline_mode<synchronous>, transform_indices = @transform_6, window_bounds = array<i64: 32, 64>}, {pipeline_mode = #tpu.pipeline_mode<synchronous>, transform_indices = @transform_7, window_bounds = array<i64: 1, 64>}, {pipeline_mode = #tpu.pipeline_mode<synchronous>, transform_indices = @transform_8, window_bounds = array<i64: 4, 8, 32>}, {pipeline_mode = #tpu.pipeline_mode<synchronous>, transform_indices = @transform_9, window_bounds = array<i64: 1, 32>}, {transform_indices = @transform_10, window_bounds = array<i64: 1, 8, 32>}]} {
    %c0_i32 = arith.constant 0 : i32
    %0 = arith.cmpi eq, %arg1, %c0_i32 : i32
    %1 = arith.extui %0 : i1 to i32
    %c0_i32_0 = arith.constant 0 : i32
    %2 = arith.cmpi ne, %1, %c0_i32_0 : i32
    scf.if %2 {
      %c0_84 = arith.constant 0 : index
      %c0_85 = arith.constant 0 : index
      %c0_86 = arith.constant 0 : index
      %158 = vector.load %arg2[%c0_84, %c0_85, %c0_86] : memref<1x8x32xf32, #tpu.memory_space<vmem>>, vector<1x8x32xf32>
      %159 = vector.shape_cast %158 : vector<1x8x32xf32> to vector<8x32xf32>
      %c0_87 = arith.constant 0 : index
      %c0_88 = arith.constant 0 : index
      %160 = vector.load %arg4[%c0_87, %c0_88] : memref<1x32xf32, #tpu.memory_space<vmem>>, vector<1x32xf32>
      %c0_89 = arith.constant 0 : index
      %c0_90 = arith.constant 0 : index
      %161 = vector.load %arg5[%c0_89, %c0_90] : memref<1x32xf32, #tpu.memory_space<vmem>>, vector<1x32xf32>
      %cst_91 = arith.constant dense<0.000000e+00> : vector<8xf32>
      %162 = vector.multi_reduction <add>, %159, %cst_91 [1] : vector<8x32xf32> to vector<8xf32>
      %163 = vector.shape_cast %162 : vector<8xf32> to vector<8x1xf32>
      %cst_92 = arith.constant 3.200000e+01 : f32
      %164 = vector.broadcast %cst_92 : f32 to vector<8x1xf32>
      %165 = arith.divf %163, %164 : vector<8x1xf32>
      %166 = vector.broadcast %165 : vector<8x1xf32> to vector<8x32xf32>
      %167 = arith.subf %159, %166 : vector<8x32xf32>
      %168 = arith.mulf %167, %167 : vector<8x32xf32>
      %cst_93 = arith.constant dense<0.000000e+00> : vector<8xf32>
      %169 = vector.multi_reduction <add>, %168, %cst_93 [1] : vector<8x32xf32> to vector<8xf32>
      %170 = vector.shape_cast %169 : vector<8xf32> to vector<8x1xf32>
      %cst_94 = arith.constant 3.200000e+01 : f32
      %171 = vector.broadcast %cst_94 : f32 to vector<8x1xf32>
      %172 = arith.divf %170, %171 : vector<8x1xf32>
      %173 = vector.broadcast %165 : vector<8x1xf32> to vector<8x32xf32>
      %174 = arith.subf %159, %173 : vector<8x32xf32>
      %cst_95 = arith.constant 9.99999974E-6 : f32
      %175 = vector.broadcast %cst_95 : f32 to vector<8x1xf32>
      %176 = arith.addf %172, %175 : vector<8x1xf32>
      %177 = math.rsqrt %176 : vector<8x1xf32>
      %178 = vector.broadcast %177 : vector<8x1xf32> to vector<8x32xf32>
      %179 = arith.mulf %174, %178 : vector<8x32xf32>
      %180 = vector.broadcast %160 : vector<1x32xf32> to vector<8x32xf32>
      %181 = arith.mulf %179, %180 : vector<8x32xf32>
      %182 = vector.broadcast %161 : vector<1x32xf32> to vector<8x32xf32>
      %183 = arith.addf %181, %182 : vector<8x32xf32>
      %184 = arith.truncf %183 : vector<8x32xf32> to vector<8x32xbf16>
      %c0_96 = arith.constant 0 : index
      %c0_97 = arith.constant 0 : index
      %185 = vector.load %arg6[%c0_96, %c0_97] : memref<32x32xbf16, #tpu.memory_space<vmem>>, vector<32x32xbf16>
      %cst_98 = arith.constant dense<0.000000e+00> : vector<8x32xf32>
      %186 = tpu.matmul %184, %185, %cst_98 {dimension_numbers = #tpu.dot_dimension_numbers<[1], [0], [0], [1], [0, 0, 1, 1], [], []>} : vector<8x32xbf16>, vector<32x32xbf16>, vector<8x32xf32> -> vector<8x32xf32>
      %c0_99 = arith.constant 0 : index
      %c0_100 = arith.constant 0 : index
      %187 = vector.load %arg7[%c0_99, %c0_100] : memref<1x32xf32, #tpu.memory_space<vmem>>, vector<1x32xf32>
      %188 = vector.broadcast %187 : vector<1x32xf32> to vector<8x32xf32>
      %189 = arith.addf %186, %188 : vector<8x32xf32>
      %190 = arith.truncf %189 : vector<8x32xf32> to vector<8x32xbf16>
      %c0_101 = arith.constant 0 : index
      %c0_102 = arith.constant 0 : index
      %191 = vector.load %arg13[%c0_101, %c0_102] : memref<8x32xbf16, #tpu.memory_space<vmem>>, vector<8x32xbf16>
      tpu.vector_store %arg13[%c0_101, %c0_102], %190 {strides = array<i32>} : memref<8x32xbf16, #tpu.memory_space<vmem>>, vector<8x32xbf16>,
      %cst_103 = arith.constant 0xFF800000 : f32
      %192 = vector.broadcast %cst_103 : f32 to vector<8x4xf32>
      %c0_104 = arith.constant 0 : index
      %c0_105 = arith.constant 0 : index
      %193 = vector.load %arg14[%c0_104, %c0_105] : memref<8x4xf32, #tpu.memory_space<vmem>>, vector<8x4xf32>
      tpu.vector_store %arg14[%c0_104, %c0_105], %192 {strides = array<i32>} : memref<8x4xf32, #tpu.memory_space<vmem>>, vector<8x4xf32>,
      %cst_106 = arith.constant 0.000000e+00 : f32
      %194 = vector.broadcast %cst_106 : f32 to vector<8x4xf32>
      %c0_107 = arith.constant 0 : index
      %c0_108 = arith.constant 0 : index
      %195 = vector.load %arg15[%c0_107, %c0_108] : memref<8x4xf32, #tpu.memory_space<vmem>>, vector<8x4xf32>
      tpu.vector_store %arg15[%c0_107, %c0_108], %194 {strides = array<i32>} : memref<8x4xf32, #tpu.memory_space<vmem>>, vector<8x4xf32>,
      %cst_109 = arith.constant 0.000000e+00 : f32
      %196 = vector.broadcast %cst_109 : f32 to vector<8x32xf32>
      %c0_110 = arith.constant 0 : index
      %c0_111 = arith.constant 0 : index
      %197 = vector.load %arg16[%c0_110, %c0_111] : memref<8x32xf32, #tpu.memory_space<vmem>>, vector<8x32xf32>
      tpu.vector_store %arg16[%c0_110, %c0_111], %196 {strides = array<i32>} : memref<8x32xf32, #tpu.memory_space<vmem>>, vector<8x32xf32>,
    } else {
    }
    %c0 = arith.constant 0 : index
    %c0_1 = arith.constant 0 : index
    %c0_2 = arith.constant 0 : index
    %3 = vector.load %arg3[%c0, %c0_1, %c0_2] : memref<1x8x32xf32, #tpu.memory_space<vmem>>, vector<1x8x32xf32>
    %4 = vector.shape_cast %3 : vector<1x8x32xf32> to vector<8x32xf32>
    %c0_3 = arith.constant 0 : index
    %c0_4 = arith.constant 0 : index
    %5 = vector.load %arg4[%c0_3, %c0_4] : memref<1x32xf32, #tpu.memory_space<vmem>>, vector<1x32xf32>
    %c0_5 = arith.constant 0 : index
    %c0_6 = arith.constant 0 : index
    %6 = vector.load %arg5[%c0_5, %c0_6] : memref<1x32xf32, #tpu.memory_space<vmem>>, vector<1x32xf32>
    %cst = arith.constant dense<0.000000e+00> : vector<8xf32>
    %7 = vector.multi_reduction <add>, %4, %cst [1] : vector<8x32xf32> to vector<8xf32>
    %8 = vector.shape_cast %7 : vector<8xf32> to vector<8x1xf32>
    %cst_7 = arith.constant 3.200000e+01 : f32
    %9 = vector.broadcast %cst_7 : f32 to vector<8x1xf32>
    %10 = arith.divf %8, %9 : vector<8x1xf32>
    %11 = vector.broadcast %10 : vector<8x1xf32> to vector<8x32xf32>
    %12 = arith.subf %4, %11 : vector<8x32xf32>
    %13 = arith.mulf %12, %12 : vector<8x32xf32>
    %cst_8 = arith.constant dense<0.000000e+00> : vector<8xf32>
    %14 = vector.multi_reduction <add>, %13, %cst_8 [1] : vector<8x32xf32> to vector<8xf32>
    %15 = vector.shape_cast %14 : vector<8xf32> to vector<8x1xf32>
    %cst_9 = arith.constant 3.200000e+01 : f32
    %16 = vector.broadcast %cst_9 : f32 to vector<8x1xf32>
    %17 = arith.divf %15, %16 : vector<8x1xf32>
    %18 = vector.broadcast %10 : vector<8x1xf32> to vector<8x32xf32>
    %19 = arith.subf %4, %18 : vector<8x32xf32>
    %cst_10 = arith.constant 9.99999974E-6 : f32
    %20 = vector.broadcast %cst_10 : f32 to vector<8x1xf32>
    %21 = arith.addf %17, %20 : vector<8x1xf32>
    %22 = math.rsqrt %21 : vector<8x1xf32>
    %23 = vector.broadcast %22 : vector<8x1xf32> to vector<8x32xf32>
    %24 = arith.mulf %19, %23 : vector<8x32xf32>
    %25 = vector.broadcast %5 : vector<1x32xf32> to vector<8x32xf32>
    %26 = arith.mulf %24, %25 : vector<8x32xf32>
    %27 = vector.broadcast %6 : vector<1x32xf32> to vector<8x32xf32>
    %28 = arith.addf %26, %27 : vector<8x32xf32>
    %29 = arith.truncf %28 : vector<8x32xf32> to vector<8x32xbf16>
    %c0_11 = arith.constant 0 : index
    %c0_12 = arith.constant 0 : index
    %30 = vector.load %arg8[%c0_11, %c0_12] : memref<32x64xbf16, #tpu.memory_space<vmem>>, vector<32x64xbf16>
    %cst_13 = arith.constant dense<0.000000e+00> : vector<8x64xf32>
    %31 = tpu.matmul %29, %30, %cst_13 {dimension_numbers = #tpu.dot_dimension_numbers<[1], [0], [0], [1], [0, 0, 1, 1], [], []>} : vector<8x32xbf16>, vector<32x64xbf16>, vector<8x64xf32> -> vector<8x64xf32>
    %c0_14 = arith.constant 0 : index
    %c0_15 = arith.constant 0 : index
    %32 = vector.load %arg9[%c0_14, %c0_15] : memref<1x64xf32, #tpu.memory_space<vmem>>, vector<1x64xf32>
    %33 = vector.broadcast %32 : vector<1x64xf32> to vector<8x64xf32>
    %34 = arith.addf %31, %33 : vector<8x64xf32>
    %c0_16 = arith.constant 0 : index
    %c0_17 = arith.constant 0 : index
    %35 = vector.load %arg13[%c0_16, %c0_17] : memref<8x32xbf16, #tpu.memory_space<vmem>>, vector<8x8xbf16>
    %36 = vector.extract_strided_slice %34 {offsets = [0, 0], sizes = [8, 8], strides = [1, 1]} : vector<8x64xf32> to vector<8x8xf32>
    %37 = arith.truncf %36 : vector<8x8xf32> to vector<8x8xbf16>
    %38 = vector.extract_strided_slice %34 {offsets = [0, 32], sizes = [8, 8], strides = [1, 1]} : vector<8x64xf32> to vector<8x8xf32>
    %39 = arith.truncf %38 : vector<8x8xf32> to vector<8x8xbf16>
    %40 = tpu.transpose %37, [1, 0] : vector<8x8xbf16> -> vector<8x8xbf16>
    %cst_18 = arith.constant dense<0.000000e+00> : vector<8x8xf32>
    %41 = tpu.matmul %35, %40, %cst_18 {dimension_numbers = #tpu.dot_dimension_numbers<[1], [0], [0], [1], [0, 0, 1, 1], [], []>} : vector<8x8xbf16>, vector<8x8xbf16>, vector<8x8xf32> -> vector<8x8xf32>
    %c0_19 = arith.constant 0 : index
    %c0_20 = arith.constant 0 : index
    %42 = vector.load %arg14[%c0_19, %c0_20] : memref<8x4xf32, #tpu.memory_space<vmem>>, vector<8x1xf32>
    %cst_21 = arith.constant dense<0xFF800000> : vector<8xf32>
    %43 = vector.multi_reduction <maximumf>, %41, %cst_21 [1] : vector<8x8xf32> to vector<8xf32>
    %44 = vector.shape_cast %43 : vector<8xf32> to vector<8x1xf32>
    %45 = arith.maximumf %42, %44 : vector<8x1xf32>
    %46 = arith.subf %42, %45 : vector<8x1xf32>
    %47 = math.exp %46 : vector<8x1xf32>
    %48 = vector.broadcast %45 : vector<8x1xf32> to vector<8x8xf32>
    %49 = arith.subf %41, %48 : vector<8x8xf32>
    %50 = math.exp %49 : vector<8x8xf32>
    %c0_22 = arith.constant 0 : index
    %c0_23 = arith.constant 0 : index
    %51 = vector.load %arg15[%c0_22, %c0_23] : memref<8x4xf32, #tpu.memory_space<vmem>>, vector<8x1xf32>
    %52 = arith.mulf %47, %51 : vector<8x1xf32>
    %cst_24 = arith.constant dense<0.000000e+00> : vector<8xf32>
    %53 = vector.multi_reduction <add>, %50, %cst_24 [1] : vector<8x8xf32> to vector<8xf32>
    %54 = vector.shape_cast %53 : vector<8xf32> to vector<8x1xf32>
    %55 = arith.addf %52, %54 : vector<8x1xf32>
    %c0_25 = arith.constant 0 : index
    %c0_26 = arith.constant 0 : index
    %56 = vector.load %arg15[%c0_25, %c0_26] : memref<8x4xf32, #tpu.memory_space<vmem>>, vector<8x1xf32>
    tpu.vector_store %arg15[%c0_25, %c0_26], %55 {strides = array<i32>} : memref<8x4xf32, #tpu.memory_space<vmem>>, vector<8x1xf32>,
    %c0_27 = arith.constant 0 : index
    %c0_28 = arith.constant 0 : index
    %57 = vector.load %arg16[%c0_27, %c0_28] : memref<8x32xf32, #tpu.memory_space<vmem>>, vector<8x8xf32>
    %58 = vector.broadcast %47 : vector<8x1xf32> to vector<8x8xf32>
    %59 = arith.mulf %58, %57 : vector<8x8xf32>
    %60 = arith.truncf %50 : vector<8x8xf32> to vector<8x8xbf16>
    %cst_29 = arith.constant dense<0.000000e+00> : vector<8x8xf32>
    %61 = tpu.matmul %60, %39, %cst_29 {dimension_numbers = #tpu.dot_dimension_numbers<[1], [0], [0], [1], [0, 0, 1, 1], [], []>} : vector<8x8xbf16>, vector<8x8xbf16>, vector<8x8xf32> -> vector<8x8xf32>
    %62 = arith.addf %59, %61 : vector<8x8xf32>
    %c0_30 = arith.constant 0 : index
    %c0_31 = arith.constant 0 : index
    %63 = vector.load %arg16[%c0_30, %c0_31] : memref<8x32xf32, #tpu.memory_space<vmem>>, vector<8x8xf32>
    tpu.vector_store %arg16[%c0_30, %c0_31], %62 {strides = array<i32>} : memref<8x32xf32, #tpu.memory_space<vmem>>, vector<8x8xf32>,
    %c0_32 = arith.constant 0 : index
    %c0_33 = arith.constant 0 : index
    %64 = vector.load %arg14[%c0_32, %c0_33] : memref<8x4xf32, #tpu.memory_space<vmem>>, vector<8x1xf32>
    tpu.vector_store %arg14[%c0_32, %c0_33], %45 {strides = array<i32>} : memref<8x4xf32, #tpu.memory_space<vmem>>, vector<8x1xf32>,
    %c0_34 = arith.constant 0 : index
    %c8 = arith.constant 8 : index
    %65 = vector.load %arg13[%c0_34, %c8] : memref<8x32xbf16, #tpu.memory_space<vmem>>, vector<8x8xbf16>
    %66 = vector.extract_strided_slice %34 {offsets = [0, 8], sizes = [8, 8], strides = [1, 1]} : vector<8x64xf32> to vector<8x8xf32>
    %67 = arith.truncf %66 : vector<8x8xf32> to vector<8x8xbf16>
    %68 = vector.extract_strided_slice %34 {offsets = [0, 40], sizes = [8, 8], strides = [1, 1]} : vector<8x64xf32> to vector<8x8xf32>
    %69 = arith.truncf %68 : vector<8x8xf32> to vector<8x8xbf16>
    %70 = tpu.transpose %67, [1, 0] : vector<8x8xbf16> -> vector<8x8xbf16>
    %cst_35 = arith.constant dense<0.000000e+00> : vector<8x8xf32>
    %71 = tpu.matmul %65, %70, %cst_35 {dimension_numbers = #tpu.dot_dimension_numbers<[1], [0], [0], [1], [0, 0, 1, 1], [], []>} : vector<8x8xbf16>, vector<8x8xbf16>, vector<8x8xf32> -> vector<8x8xf32>
    %c0_36 = arith.constant 0 : index
    %c1 = arith.constant 1 : index
    %72 = vector.load %arg14[%c0_36, %c1] : memref<8x4xf32, #tpu.memory_space<vmem>>, vector<8x1xf32>
    %cst_37 = arith.constant dense<0xFF800000> : vector<8xf32>
    %73 = vector.multi_reduction <maximumf>, %71, %cst_37 [1] : vector<8x8xf32> to vector<8xf32>
    %74 = vector.shape_cast %73 : vector<8xf32> to vector<8x1xf32>
    %75 = arith.maximumf %72, %74 : vector<8x1xf32>
    %76 = arith.subf %72, %75 : vector<8x1xf32>
    %77 = math.exp %76 : vector<8x1xf32>
    %78 = vector.broadcast %75 : vector<8x1xf32> to vector<8x8xf32>
    %79 = arith.subf %71, %78 : vector<8x8xf32>
    %80 = math.exp %79 : vector<8x8xf32>
    %c0_38 = arith.constant 0 : index
    %c1_39 = arith.constant 1 : index
    %81 = vector.load %arg15[%c0_38, %c1_39] : memref<8x4xf32, #tpu.memory_space<vmem>>, vector<8x1xf32>
    %82 = arith.mulf %77, %81 : vector<8x1xf32>
    %cst_40 = arith.constant dense<0.000000e+00> : vector<8xf32>
    %83 = vector.multi_reduction <add>, %80, %cst_40 [1] : vector<8x8xf32> to vector<8xf32>
    %84 = vector.shape_cast %83 : vector<8xf32> to vector<8x1xf32>
    %85 = arith.addf %82, %84 : vector<8x1xf32>
    %c0_41 = arith.constant 0 : index
    %c1_42 = arith.constant 1 : index
    %86 = vector.load %arg15[%c0_41, %c1_42] : memref<8x4xf32, #tpu.memory_space<vmem>>, vector<8x1xf32>
    tpu.vector_store %arg15[%c0_41, %c1_42], %85 {strides = array<i32>} : memref<8x4xf32, #tpu.memory_space<vmem>>, vector<8x1xf32>,
    %c0_43 = arith.constant 0 : index
    %c8_44 = arith.constant 8 : index
    %87 = vector.load %arg16[%c0_43, %c8_44] : memref<8x32xf32, #tpu.memory_space<vmem>>, vector<8x8xf32>
    %88 = vector.broadcast %77 : vector<8x1xf32> to vector<8x8xf32>
    %89 = arith.mulf %88, %87 : vector<8x8xf32>
    %90 = arith.truncf %80 : vector<8x8xf32> to vector<8x8xbf16>
    %cst_45 = arith.constant dense<0.000000e+00> : vector<8x8xf32>
    %91 = tpu.matmul %90, %69, %cst_45 {dimension_numbers = #tpu.dot_dimension_numbers<[1], [0], [0], [1], [0, 0, 1, 1], [], []>} : vector<8x8xbf16>, vector<8x8xbf16>, vector<8x8xf32> -> vector<8x8xf32>
    %92 = arith.addf %89, %91 : vector<8x8xf32>
    %c0_46 = arith.constant 0 : index
    %c8_47 = arith.constant 8 : index
    %93 = vector.load %arg16[%c0_46, %c8_47] : memref<8x32xf32, #tpu.memory_space<vmem>>, vector<8x8xf32>
    tpu.vector_store %arg16[%c0_46, %c8_47], %92 {strides = array<i32>} : memref<8x32xf32, #tpu.memory_space<vmem>>, vector<8x8xf32>,
    %c0_48 = arith.constant 0 : index
    %c1_49 = arith.constant 1 : index
    %94 = vector.load %arg14[%c0_48, %c1_49] : memref<8x4xf32, #tpu.memory_space<vmem>>, vector<8x1xf32>
    tpu.vector_store %arg14[%c0_48, %c1_49], %75 {strides = array<i32>} : memref<8x4xf32, #tpu.memory_space<vmem>>, vector<8x1xf32>,
    %c0_50 = arith.constant 0 : index
    %c16 = arith.constant 16 : index
    %95 = vector.load %arg13[%c0_50, %c16] : memref<8x32xbf16, #tpu.memory_space<vmem>>, vector<8x8xbf16>
    %96 = vector.extract_strided_slice %34 {offsets = [0, 16], sizes = [8, 8], strides = [1, 1]} : vector<8x64xf32> to vector<8x8xf32>
    %97 = arith.truncf %96 : vector<8x8xf32> to vector<8x8xbf16>
    %98 = vector.extract_strided_slice %34 {offsets = [0, 48], sizes = [8, 8], strides = [1, 1]} : vector<8x64xf32> to vector<8x8xf32>
    %99 = arith.truncf %98 : vector<8x8xf32> to vector<8x8xbf16>
    %100 = tpu.transpose %97, [1, 0] : vector<8x8xbf16> -> vector<8x8xbf16>
    %cst_51 = arith.constant dense<0.000000e+00> : vector<8x8xf32>
    %101 = tpu.matmul %95, %100, %cst_51 {dimension_numbers = #tpu.dot_dimension_numbers<[1], [0], [0], [1], [0, 0, 1, 1], [], []>} : vector<8x8xbf16>, vector<8x8xbf16>, vector<8x8xf32> -> vector<8x8xf32>
    %c0_52 = arith.constant 0 : index
    %c2 = arith.constant 2 : index
    %102 = vector.load %arg14[%c0_52, %c2] : memref<8x4xf32, #tpu.memory_space<vmem>>, vector<8x1xf32>
    %cst_53 = arith.constant dense<0xFF800000> : vector<8xf32>
    %103 = vector.multi_reduction <maximumf>, %101, %cst_53 [1] : vector<8x8xf32> to vector<8xf32>
    %104 = vector.shape_cast %103 : vector<8xf32> to vector<8x1xf32>
    %105 = arith.maximumf %102, %104 : vector<8x1xf32>
    %106 = arith.subf %102, %105 : vector<8x1xf32>
    %107 = math.exp %106 : vector<8x1xf32>
    %108 = vector.broadcast %105 : vector<8x1xf32> to vector<8x8xf32>
    %109 = arith.subf %101, %108 : vector<8x8xf32>
    %110 = math.exp %109 : vector<8x8xf32>
    %c0_54 = arith.constant 0 : index
    %c2_55 = arith.constant 2 : index
    %111 = vector.load %arg15[%c0_54, %c2_55] : memref<8x4xf32, #tpu.memory_space<vmem>>, vector<8x1xf32>
    %112 = arith.mulf %107, %111 : vector<8x1xf32>
    %cst_56 = arith.constant dense<0.000000e+00> : vector<8xf32>
    %113 = vector.multi_reduction <add>, %110, %cst_56 [1] : vector<8x8xf32> to vector<8xf32>
    %114 = vector.shape_cast %113 : vector<8xf32> to vector<8x1xf32>
    %115 = arith.addf %112, %114 : vector<8x1xf32>
    %c0_57 = arith.constant 0 : index
    %c2_58 = arith.constant 2 : index
    %116 = vector.load %arg15[%c0_57, %c2_58] : memref<8x4xf32, #tpu.memory_space<vmem>>, vector<8x1xf32>
    tpu.vector_store %arg15[%c0_57, %c2_58], %115 {strides = array<i32>} : memref<8x4xf32, #tpu.memory_space<vmem>>, vector<8x1xf32>,
    %c0_59 = arith.constant 0 : index
    %c16_60 = arith.constant 16 : index
    %117 = vector.load %arg16[%c0_59, %c16_60] : memref<8x32xf32, #tpu.memory_space<vmem>>, vector<8x8xf32>
    %118 = vector.broadcast %107 : vector<8x1xf32> to vector<8x8xf32>
    %119 = arith.mulf %118, %117 : vector<8x8xf32>
    %120 = arith.truncf %110 : vector<8x8xf32> to vector<8x8xbf16>
    %cst_61 = arith.constant dense<0.000000e+00> : vector<8x8xf32>
    %121 = tpu.matmul %120, %99, %cst_61 {dimension_numbers = #tpu.dot_dimension_numbers<[1], [0], [0], [1], [0, 0, 1, 1], [], []>} : vector<8x8xbf16>, vector<8x8xbf16>, vector<8x8xf32> -> vector<8x8xf32>
    %122 = arith.addf %119, %121 : vector<8x8xf32>
    %c0_62 = arith.constant 0 : index
    %c16_63 = arith.constant 16 : index
    %123 = vector.load %arg16[%c0_62, %c16_63] : memref<8x32xf32, #tpu.memory_space<vmem>>, vector<8x8xf32>
    tpu.vector_store %arg16[%c0_62, %c16_63], %122 {strides = array<i32>} : memref<8x32xf32, #tpu.memory_space<vmem>>, vector<8x8xf32>,
    %c0_64 = arith.constant 0 : index
    %c2_65 = arith.constant 2 : index
    %124 = vector.load %arg14[%c0_64, %c2_65] : memref<8x4xf32, #tpu.memory_space<vmem>>, vector<8x1xf32>
    tpu.vector_store %arg14[%c0_64, %c2_65], %105 {strides = array<i32>} : memref<8x4xf32, #tpu.memory_space<vmem>>, vector<8x1xf32>,
    %c0_66 = arith.constant 0 : index
    %c24 = arith.constant 24 : index
    %125 = vector.load %arg13[%c0_66, %c24] : memref<8x32xbf16, #tpu.memory_space<vmem>>, vector<8x8xbf16>
    %126 = vector.extract_strided_slice %34 {offsets = [0, 24], sizes = [8, 8], strides = [1, 1]} : vector<8x64xf32> to vector<8x8xf32>
    %127 = arith.truncf %126 : vector<8x8xf32> to vector<8x8xbf16>
    %128 = vector.extract_strided_slice %34 {offsets = [0, 56], sizes = [8, 8], strides = [1, 1]} : vector<8x64xf32> to vector<8x8xf32>
    %129 = arith.truncf %128 : vector<8x8xf32> to vector<8x8xbf16>
    %130 = tpu.transpose %127, [1, 0] : vector<8x8xbf16> -> vector<8x8xbf16>
    %cst_67 = arith.constant dense<0.000000e+00> : vector<8x8xf32>
    %131 = tpu.matmul %125, %130, %cst_67 {dimension_numbers = #tpu.dot_dimension_numbers<[1], [0], [0], [1], [0, 0, 1, 1], [], []>} : vector<8x8xbf16>, vector<8x8xbf16>, vector<8x8xf32> -> vector<8x8xf32>
    %c0_68 = arith.constant 0 : index
    %c3 = arith.constant 3 : index
    %132 = vector.load %arg14[%c0_68, %c3] : memref<8x4xf32, #tpu.memory_space<vmem>>, vector<8x1xf32>
    %cst_69 = arith.constant dense<0xFF800000> : vector<8xf32>
    %133 = vector.multi_reduction <maximumf>, %131, %cst_69 [1] : vector<8x8xf32> to vector<8xf32>
    %134 = vector.shape_cast %133 : vector<8xf32> to vector<8x1xf32>
    %135 = arith.maximumf %132, %134 : vector<8x1xf32>
    %136 = arith.subf %132, %135 : vector<8x1xf32>
    %137 = math.exp %136 : vector<8x1xf32>
    %138 = vector.broadcast %135 : vector<8x1xf32> to vector<8x8xf32>
    %139 = arith.subf %131, %138 : vector<8x8xf32>
    %140 = math.exp %139 : vector<8x8xf32>
    %c0_70 = arith.constant 0 : index
    %c3_71 = arith.constant 3 : index
    %141 = vector.load %arg15[%c0_70, %c3_71] : memref<8x4xf32, #tpu.memory_space<vmem>>, vector<8x1xf32>
    %142 = arith.mulf %137, %141 : vector<8x1xf32>
    %cst_72 = arith.constant dense<0.000000e+00> : vector<8xf32>
    %143 = vector.multi_reduction <add>, %140, %cst_72 [1] : vector<8x8xf32> to vector<8xf32>
    %144 = vector.shape_cast %143 : vector<8xf32> to vector<8x1xf32>
    %145 = arith.addf %142, %144 : vector<8x1xf32>
    %c0_73 = arith.constant 0 : index
    %c3_74 = arith.constant 3 : index
    %146 = vector.load %arg15[%c0_73, %c3_74] : memref<8x4xf32, #tpu.memory_space<vmem>>, vector<8x1xf32>
    tpu.vector_store %arg15[%c0_73, %c3_74], %145 {strides = array<i32>} : memref<8x4xf32, #tpu.memory_space<vmem>>, vector<8x1xf32>,
    %c0_75 = arith.constant 0 : index
    %c24_76 = arith.constant 24 : index
    %147 = vector.load %arg16[%c0_75, %c24_76] : memref<8x32xf32, #tpu.memory_space<vmem>>, vector<8x8xf32>
    %148 = vector.broadcast %137 : vector<8x1xf32> to vector<8x8xf32>
    %149 = arith.mulf %148, %147 : vector<8x8xf32>
    %150 = arith.truncf %140 : vector<8x8xf32> to vector<8x8xbf16>
    %cst_77 = arith.constant dense<0.000000e+00> : vector<8x8xf32>
    %151 = tpu.matmul %150, %129, %cst_77 {dimension_numbers = #tpu.dot_dimension_numbers<[1], [0], [0], [1], [0, 0, 1, 1], [], []>} : vector<8x8xbf16>, vector<8x8xbf16>, vector<8x8xf32> -> vector<8x8xf32>
    %152 = arith.addf %149, %151 : vector<8x8xf32>
    %c0_78 = arith.constant 0 : index
    %c24_79 = arith.constant 24 : index
    %153 = vector.load %arg16[%c0_78, %c24_79] : memref<8x32xf32, #tpu.memory_space<vmem>>, vector<8x8xf32>
    tpu.vector_store %arg16[%c0_78, %c24_79], %152 {strides = array<i32>} : memref<8x32xf32, #tpu.memory_space<vmem>>, vector<8x8xf32>,
    %c0_80 = arith.constant 0 : index
    %c3_81 = arith.constant 3 : index
    %154 = vector.load %arg14[%c0_80, %c3_81] : memref<8x4xf32, #tpu.memory_space<vmem>>, vector<8x1xf32>
    tpu.vector_store %arg14[%c0_80, %c3_81], %135 {strides = array<i32>} : memref<8x4xf32, #tpu.memory_space<vmem>>, vector<8x1xf32>,
    %c0_i32_82 = arith.constant 0 : i32
    %155 = arith.cmpi eq, %arg1, %c0_i32_82 : i32
    %156 = arith.extui %155 : i1 to i32
    %c0_i32_83 = arith.constant 0 : i32
    %157 = arith.cmpi ne, %156, %c0_i32_83 : i32
    scf.if %157 {
      %cst_84 = arith.constant 0.000000e+00 : f32
      %158 = vector.broadcast %cst_84 : f32 to vector<8x32xf32>
      %c0_85 = arith.constant 0 : index
      %c0_86 = arith.constant 0 : index
      %159 = vector.load %arg16[%c0_85, %c0_86] : memref<8x32xf32, #tpu.memory_space<vmem>>, vector<8x8xf32>
      %c0_87 = arith.constant 0 : index
      %c0_88 = arith.constant 0 : index
      %160 = vector.load %arg15[%c0_87, %c0_88] : memref<8x4xf32, #tpu.memory_space<vmem>>, vector<8x1xf32>
      %161 = tpu.reciprocal %160 {approx = true} : vector<8x1xf32> -> vector<8x1xf32>
      %162 = vector.broadcast %161 : vector<8x1xf32> to vector<8x8xf32>
      %163 = arith.mulf %159, %162 : vector<8x8xf32>
      %164 = arith.truncf %163 : vector<8x8xf32> to vector<8x8xbf16>
      %c0_89 = arith.constant 0 : index
      %c0_90 = arith.constant 0 : index
      %c0_91 = arith.constant 0 : index
      %165 = vector.load %arg10[%c0_89, %c0_90, %c0_91] : memref<4x8x32xbf16, #tpu.memory_space<vmem>>, vector<1x8x32xbf16>
      %166 = vector.shape_cast %165 : vector<1x8x32xbf16> to vector<8x32xbf16>
      %cst_92 = arith.constant dense<0.000000e+00> : vector<8x32xf32>
      %167 = tpu.matmul %164, %166, %cst_92 {dimension_numbers = #tpu.dot_dimension_numbers<[1], [0], [0], [1], [0, 0, 1, 1], [], []>} : vector<8x8xbf16>, vector<8x32xbf16>, vector<8x32xf32> -> vector<8x32xf32>
      %168 = arith.addf %158, %167 : vector<8x32xf32>
      %c0_93 = arith.constant 0 : index
      %c8_94 = arith.constant 8 : index
      %169 = vector.load %arg16[%c0_93, %c8_94] : memref<8x32xf32, #tpu.memory_space<vmem>>, vector<8x8xf32>
      %c0_95 = arith.constant 0 : index
      %c1_96 = arith.constant 1 : index
      %170 = vector.load %arg15[%c0_95, %c1_96] : memref<8x4xf32, #tpu.memory_space<vmem>>, vector<8x1xf32>
      %171 = tpu.reciprocal %170 {approx = true} : vector<8x1xf32> -> vector<8x1xf32>
      %172 = vector.broadcast %171 : vector<8x1xf32> to vector<8x8xf32>
      %173 = arith.mulf %169, %172 : vector<8x8xf32>
      %174 = arith.truncf %173 : vector<8x8xf32> to vector<8x8xbf16>
      %c1_97 = arith.constant 1 : index
      %c0_98 = arith.constant 0 : index
      %c0_99 = arith.constant 0 : index
      %175 = vector.load %arg10[%c1_97, %c0_98, %c0_99] : memref<4x8x32xbf16, #tpu.memory_space<vmem>>, vector<1x8x32xbf16>
      %176 = vector.shape_cast %175 : vector<1x8x32xbf16> to vector<8x32xbf16>
      %cst_100 = arith.constant dense<0.000000e+00> : vector<8x32xf32>
      %177 = tpu.matmul %174, %176, %cst_100 {dimension_numbers = #tpu.dot_dimension_numbers<[1], [0], [0], [1], [0, 0, 1, 1], [], []>} : vector<8x8xbf16>, vector<8x32xbf16>, vector<8x32xf32> -> vector<8x32xf32>
      %178 = arith.addf %168, %177 : vector<8x32xf32>
      %c0_101 = arith.constant 0 : index
      %c16_102 = arith.constant 16 : index
      %179 = vector.load %arg16[%c0_101, %c16_102] : memref<8x32xf32, #tpu.memory_space<vmem>>, vector<8x8xf32>
      %c0_103 = arith.constant 0 : index
      %c2_104 = arith.constant 2 : index
      %180 = vector.load %arg15[%c0_103, %c2_104] : memref<8x4xf32, #tpu.memory_space<vmem>>, vector<8x1xf32>
      %181 = tpu.reciprocal %180 {approx = true} : vector<8x1xf32> -> vector<8x1xf32>
      %182 = vector.broadcast %181 : vector<8x1xf32> to vector<8x8xf32>
      %183 = arith.mulf %179, %182 : vector<8x8xf32>
      %184 = arith.truncf %183 : vector<8x8xf32> to vector<8x8xbf16>
      %c2_105 = arith.constant 2 : index
      %c0_106 = arith.constant 0 : index
      %c0_107 = arith.constant 0 : index
      %185 = vector.load %arg10[%c2_105, %c0_106, %c0_107] : memref<4x8x32xbf16, #tpu.memory_space<vmem>>, vector<1x8x32xbf16>
      %186 = vector.shape_cast %185 : vector<1x8x32xbf16> to vector<8x32xbf16>
      %cst_108 = arith.constant dense<0.000000e+00> : vector<8x32xf32>
      %187 = tpu.matmul %184, %186, %cst_108 {dimension_numbers = #tpu.dot_dimension_numbers<[1], [0], [0], [1], [0, 0, 1, 1], [], []>} : vector<8x8xbf16>, vector<8x32xbf16>, vector<8x32xf32> -> vector<8x32xf32>
      %188 = arith.addf %178, %187 : vector<8x32xf32>
      %c0_109 = arith.constant 0 : index
      %c24_110 = arith.constant 24 : index
      %189 = vector.load %arg16[%c0_109, %c24_110] : memref<8x32xf32, #tpu.memory_space<vmem>>, vector<8x8xf32>
      %c0_111 = arith.constant 0 : index
      %c3_112 = arith.constant 3 : index
      %190 = vector.load %arg15[%c0_111, %c3_112] : memref<8x4xf32, #tpu.memory_space<vmem>>, vector<8x1xf32>
      %191 = tpu.reciprocal %190 {approx = true} : vector<8x1xf32> -> vector<8x1xf32>
      %192 = vector.broadcast %191 : vector<8x1xf32> to vector<8x8xf32>
      %193 = arith.mulf %189, %192 : vector<8x8xf32>
      %194 = arith.truncf %193 : vector<8x8xf32> to vector<8x8xbf16>
      %c3_113 = arith.constant 3 : index
      %c0_114 = arith.constant 0 : index
      %c0_115 = arith.constant 0 : index
      %195 = vector.load %arg10[%c3_113, %c0_114, %c0_115] : memref<4x8x32xbf16, #tpu.memory_space<vmem>>, vector<1x8x32xbf16>
      %196 = vector.shape_cast %195 : vector<1x8x32xbf16> to vector<8x32xbf16>
      %cst_116 = arith.constant dense<0.000000e+00> : vector<8x32xf32>
      %197 = tpu.matmul %194, %196, %cst_116 {dimension_numbers = #tpu.dot_dimension_numbers<[1], [0], [0], [1], [0, 0, 1, 1], [], []>} : vector<8x8xbf16>, vector<8x32xbf16>, vector<8x32xf32> -> vector<8x32xf32>
      %198 = arith.addf %188, %197 : vector<8x32xf32>
      %c0_117 = arith.constant 0 : index
      %c0_118 = arith.constant 0 : index
      %c0_119 = arith.constant 0 : index
      %199 = vector.load %arg2[%c0_117, %c0_118, %c0_119] : memref<1x8x32xf32, #tpu.memory_space<vmem>>, vector<1x8x32xf32>
      %200 = vector.shape_cast %199 : vector<1x8x32xf32> to vector<8x32xf32>
      %201 = arith.addf %200, %198 : vector<8x32xf32>
      %c0_120 = arith.constant 0 : index
      %c0_121 = arith.constant 0 : index
      %202 = vector.load %arg11[%c0_120, %c0_121] : memref<1x32xf32, #tpu.memory_space<vmem>>, vector<1x32xf32>
      %203 = vector.broadcast %202 : vector<1x32xf32> to vector<8x32xf32>
      %204 = arith.addf %201, %203 : vector<8x32xf32>
      %c0_122 = arith.constant 0 : index
      %c0_123 = arith.constant 0 : index
      %c0_124 = arith.constant 0 : index
      %205 = vector.load %arg12[%c0_122, %c0_123, %c0_124] : memref<1x8x32xf32, #tpu.memory_space<vmem>>, vector<1x8x32xf32>
      %206 = vector.shape_cast %205 : vector<1x8x32xf32> to vector<8x32xf32>
      %207 = vector.shape_cast %204 : vector<8x32xf32> to vector<1x8x32xf32>
      tpu.vector_store %arg12[%c0_122, %c0_123, %c0_124], %207 {strides = array<i32>} : memref<1x8x32xf32, #tpu.memory_space<vmem>>, vector<1x8x32xf32>,
    } else {
    }
    return
  }
  func.func @transform_0(%arg0: i32, %arg1: i32) -> (i32, i32, i32) {
    %c0_i32 = arith.constant 0 : i32
    %c0_i32_0 = arith.constant 0 : i32
    %c0_i32_1 = arith.constant 0 : i32
    return %arg0, %c0_i32, %c0_i32_0 : i32, i32, i32
  }
  func.func @transform_1(%arg0: i32, %arg1: i32) -> (i32, i32, i32) {
    %c0_i32 = arith.constant 0 : i32
    %c0_i32_0 = arith.constant 0 : i32
    return %arg0, %arg1, %c0_i32 : i32, i32, i32
  }
  func.func @transform_2(%arg0: i32, %arg1: i32) -> (i32, i32) {
    %c0_i32 = arith.constant 0 : i32
    %c0_i32_0 = arith.constant 0 : i32
    %c0_i32_1 = arith.constant 0 : i32
    return %c0_i32, %c0_i32_0 : i32, i32
  }
  func.func @transform_3(%arg0: i32, %arg1: i32) -> (i32, i32) {
    %c0_i32 = arith.constant 0 : i32
    %c0_i32_0 = arith.constant 0 : i32
    %c0_i32_1 = arith.constant 0 : i32
    return %c0_i32, %c0_i32_0 : i32, i32
  }
  func.func @transform_4(%arg0: i32, %arg1: i32) -> (i32, i32) {
    %c0_i32 = arith.constant 0 : i32
    %c0_i32_0 = arith.constant 0 : i32
    %c0_i32_1 = arith.constant 0 : i32
    return %c0_i32, %c0_i32_0 : i32, i32
  }
  func.func @transform_5(%arg0: i32, %arg1: i32) -> (i32, i32) {
    %c0_i32 = arith.constant 0 : i32
    %c0_i32_0 = arith.constant 0 : i32
    %c0_i32_1 = arith.constant 0 : i32
    return %c0_i32, %c0_i32_0 : i32, i32
  }
  func.func @transform_6(%arg0: i32, %arg1: i32) -> (i32, i32) {
    %c0_i32 = arith.constant 0 : i32
    %c0_i32_0 = arith.constant 0 : i32
    %c0_i32_1 = arith.constant 0 : i32
    return %c0_i32, %c0_i32_0 : i32, i32
  }
  func.func @transform_7(%arg0: i32, %arg1: i32) -> (i32, i32) {
    %c0_i32 = arith.constant 0 : i32
    %c0_i32_0 = arith.constant 0 : i32
    %c0_i32_1 = arith.constant 0 : i32
    return %c0_i32, %c0_i32_0 : i32, i32
  }
  func.func @transform_8(%arg0: i32, %arg1: i32) -> (i32, i32, i32) {
    %c0_i32 = arith.constant 0 : i32
    %c0_i32_0 = arith.constant 0 : i32
    %c0_i32_1 = arith.constant 0 : i32
    %c0_i32_2 = arith.constant 0 : i32
    return %c0_i32, %c0_i32_0, %c0_i32_1 : i32, i32, i32
  }
  func.func @transform_9(%arg0: i32, %arg1: i32) -> (i32, i32) {
    %c0_i32 = arith.constant 0 : i32
    %c0_i32_0 = arith.constant 0 : i32
    %c0_i32_1 = arith.constant 0 : i32
    return %c0_i32, %c0_i32_0 : i32, i32
  }
  func.func @transform_10(%arg0: i32, %arg1: i32) -> (i32, i32, i32) {
    %c0_i32 = arith.constant 0 : i32
    %c0_i32_0 = arith.constant 0 : i32
    %c0_i32_1 = arith.constant 0 : i32
    return %arg0, %c0_i32, %c0_i32_0 : i32, i32, i32
  }
}

module attributes {stable_mosaic.version = 11 : i64} {
  func.func @_conv_block_kernel(%arg0: i32, %arg1: memref<2x8x32xf32, #tpu.memory_space<vmem>>, %arg2: memref<1x32xf32, #tpu.memory_space<vmem>>, %arg3: memref<1x32xf32, #tpu.memory_space<vmem>>, %arg4: memref<3x32x64xbf16, #tpu.memory_space<vmem>>, %arg5: memref<1x64xf32, #tpu.memory_space<vmem>>, %arg6: memref<3x64x32xbf16, #tpu.memory_space<vmem>>, %arg7: memref<1x32xf32, #tpu.memory_space<vmem>>, %arg8: memref<1x32xf32, #tpu.memory_space<vmem>>, %arg9: memref<1x32xf32, #tpu.memory_space<vmem>>, %arg10: memref<2x8x32xf32, #tpu.memory_space<vmem>>) attributes {dimension_semantics = [#tpu.dimension_semantics<parallel>], iteration_bounds = array<i64: 1>, scalar_prefetch = 0 : i64, scratch_operands = 0 : i64, tpu.core_type = #tpu.core_type<tc>, window_params = [{transform_indices = @transform_0, window_bounds = array<i64: 2, 8, 32>}, {pipeline_mode = #tpu.pipeline_mode<synchronous>, transform_indices = @transform_1, window_bounds = array<i64: 1, 32>}, {pipeline_mode = #tpu.pipeline_mode<synchronous>, transform_indices = @transform_2, window_bounds = array<i64: 1, 32>}, {pipeline_mode = #tpu.pipeline_mode<synchronous>, transform_indices = @transform_3, window_bounds = array<i64: 3, 32, 64>}, {pipeline_mode = #tpu.pipeline_mode<synchronous>, transform_indices = @transform_4, window_bounds = array<i64: 1, 64>}, {pipeline_mode = #tpu.pipeline_mode<synchronous>, transform_indices = @transform_5, window_bounds = array<i64: 3, 64, 32>}, {pipeline_mode = #tpu.pipeline_mode<synchronous>, transform_indices = @transform_6, window_bounds = array<i64: 1, 32>}, {pipeline_mode = #tpu.pipeline_mode<synchronous>, transform_indices = @transform_7, window_bounds = array<i64: 1, 32>}, {pipeline_mode = #tpu.pipeline_mode<synchronous>, transform_indices = @transform_8, window_bounds = array<i64: 1, 32>}, {transform_indices = @transform_9, window_bounds = array<i64: 2, 8, 32>}]} {
    %c0 = arith.constant 0 : index
    %c0_0 = arith.constant 0 : index
    %c0_1 = arith.constant 0 : index
    %0 = vector.load %arg1[%c0, %c0_0, %c0_1] : memref<2x8x32xf32, #tpu.memory_space<vmem>>, vector<2x8x32xf32>
    %c0_2 = arith.constant 0 : index
    %c0_3 = arith.constant 0 : index
    %1 = vector.load %arg2[%c0_2, %c0_3] : memref<1x32xf32, #tpu.memory_space<vmem>>, vector<1x32xf32>
    %c0_4 = arith.constant 0 : index
    %c0_5 = arith.constant 0 : index
    %2 = vector.load %arg3[%c0_4, %c0_5] : memref<1x32xf32, #tpu.memory_space<vmem>>, vector<1x32xf32>
    %cst = arith.constant dense<0.000000e+00> : vector<2x8xf32>
    %3 = vector.multi_reduction <add>, %0, %cst [2] : vector<2x8x32xf32> to vector<2x8xf32>
    %4 = vector.shape_cast %3 : vector<2x8xf32> to vector<2x8x1xf32>
    %cst_6 = arith.constant 3.200000e+01 : f32
    %5 = vector.broadcast %cst_6 : f32 to vector<2x8x1xf32>
    %6 = arith.divf %4, %5 : vector<2x8x1xf32>
    %7 = vector.broadcast %6 : vector<2x8x1xf32> to vector<2x8x32xf32>
    %8 = arith.subf %0, %7 : vector<2x8x32xf32>
    %9 = arith.mulf %8, %8 : vector<2x8x32xf32>
    %cst_7 = arith.constant dense<0.000000e+00> : vector<2x8xf32>
    %10 = vector.multi_reduction <add>, %9, %cst_7 [2] : vector<2x8x32xf32> to vector<2x8xf32>
    %11 = vector.shape_cast %10 : vector<2x8xf32> to vector<2x8x1xf32>
    %cst_8 = arith.constant 3.200000e+01 : f32
    %12 = vector.broadcast %cst_8 : f32 to vector<2x8x1xf32>
    %13 = arith.divf %11, %12 : vector<2x8x1xf32>
    %14 = vector.broadcast %6 : vector<2x8x1xf32> to vector<2x8x32xf32>
    %15 = arith.subf %0, %14 : vector<2x8x32xf32>
    %cst_9 = arith.constant 9.99999974E-6 : f32
    %16 = vector.broadcast %cst_9 : f32 to vector<2x8x1xf32>
    %17 = arith.addf %13, %16 : vector<2x8x1xf32>
    %18 = math.rsqrt %17 : vector<2x8x1xf32>
    %19 = vector.broadcast %18 : vector<2x8x1xf32> to vector<2x8x32xf32>
    %20 = arith.mulf %15, %19 : vector<2x8x32xf32>
    %21 = vector.shape_cast %1 : vector<1x32xf32> to vector<1x1x32xf32>
    %22 = vector.broadcast %21 : vector<1x1x32xf32> to vector<2x8x32xf32>
    %23 = arith.mulf %20, %22 : vector<2x8x32xf32>
    %24 = vector.shape_cast %2 : vector<1x32xf32> to vector<1x1x32xf32>
    %25 = vector.broadcast %24 : vector<1x1x32xf32> to vector<2x8x32xf32>
    %26 = arith.addf %23, %25 : vector<2x8x32xf32>
    %27 = arith.truncf %26 : vector<2x8x32xf32> to vector<2x8x32xbf16>
    %28 = vector.shape_cast %27 : vector<2x8x32xbf16> to vector<16x32xbf16>
    %c1 = arith.constant 1 : index
    %c0_10 = arith.constant 0 : index
    %c0_11 = arith.constant 0 : index
    %29 = vector.load %arg4[%c1, %c0_10, %c0_11] : memref<3x32x64xbf16, #tpu.memory_space<vmem>>, vector<1x32x64xbf16>
    %30 = vector.shape_cast %29 : vector<1x32x64xbf16> to vector<32x64xbf16>
    %cst_12 = arith.constant dense<0.000000e+00> : vector<16x64xf32>
    %31 = tpu.matmul %28, %30, %cst_12 {dimension_numbers = #tpu.dot_dimension_numbers<[1], [0], [0], [1], [0, 0, 1, 1], [], []>} : vector<16x32xbf16>, vector<32x64xbf16>, vector<16x64xf32> -> vector<16x64xf32>
    %32 = vector.shape_cast %31 : vector<16x64xf32> to vector<2x8x64xf32>
    %c0_13 = arith.constant 0 : index
    %c0_14 = arith.constant 0 : index
    %33 = vector.load %arg5[%c0_13, %c0_14] : memref<1x64xf32, #tpu.memory_space<vmem>>, vector<1x64xf32>
    %34 = vector.shape_cast %33 : vector<1x64xf32> to vector<1x1x64xf32>
    %35 = vector.broadcast %34 : vector<1x1x64xf32> to vector<2x8x64xf32>
    %36 = arith.addf %32, %35 : vector<2x8x64xf32>
    %cst_15 = arith.constant 0.000000e+00 : bf16
    %37 = vector.broadcast %cst_15 : bf16 to vector<1x8x32xbf16>
    %38 = vector.extract_strided_slice %27 {offsets = [0, 0, 0], sizes = [1, 8, 32], strides = [1, 1, 1]} : vector<2x8x32xbf16> to vector<1x8x32xbf16>
    %39 = tpu.concatenate %37, %38 in 0 : vector<1x8x32xbf16>, vector<1x8x32xbf16> -> vector<2x8x32xbf16>
    %40 = vector.shape_cast %39 : vector<2x8x32xbf16> to vector<16x32xbf16>
    %c0_16 = arith.constant 0 : index
    %c0_17 = arith.constant 0 : index
    %c0_18 = arith.constant 0 : index
    %41 = vector.load %arg4[%c0_16, %c0_17, %c0_18] : memref<3x32x64xbf16, #tpu.memory_space<vmem>>, vector<1x32x64xbf16>
    %42 = vector.shape_cast %41 : vector<1x32x64xbf16> to vector<32x64xbf16>
    %cst_19 = arith.constant dense<0.000000e+00> : vector<16x64xf32>
    %43 = tpu.matmul %40, %42, %cst_19 {dimension_numbers = #tpu.dot_dimension_numbers<[1], [0], [0], [1], [0, 0, 1, 1], [], []>} : vector<16x32xbf16>, vector<32x64xbf16>, vector<16x64xf32> -> vector<16x64xf32>
    %44 = vector.shape_cast %43 : vector<16x64xf32> to vector<2x8x64xf32>
    %45 = arith.addf %36, %44 : vector<2x8x64xf32>
    %46 = vector.extract_strided_slice %27 {offsets = [1, 0, 0], sizes = [1, 8, 32], strides = [1, 1, 1]} : vector<2x8x32xbf16> to vector<1x8x32xbf16>
    %cst_20 = arith.constant 0.000000e+00 : bf16
    %47 = vector.broadcast %cst_20 : bf16 to vector<1x8x32xbf16>
    %48 = tpu.concatenate %46, %47 in 0 : vector<1x8x32xbf16>, vector<1x8x32xbf16> -> vector<2x8x32xbf16>
    %49 = vector.shape_cast %48 : vector<2x8x32xbf16> to vector<16x32xbf16>
    %c2 = arith.constant 2 : index
    %c0_21 = arith.constant 0 : index
    %c0_22 = arith.constant 0 : index
    %50 = vector.load %arg4[%c2, %c0_21, %c0_22] : memref<3x32x64xbf16, #tpu.memory_space<vmem>>, vector<1x32x64xbf16>
    %51 = vector.shape_cast %50 : vector<1x32x64xbf16> to vector<32x64xbf16>
    %cst_23 = arith.constant dense<0.000000e+00> : vector<16x64xf32>
    %52 = tpu.matmul %49, %51, %cst_23 {dimension_numbers = #tpu.dot_dimension_numbers<[1], [0], [0], [1], [0, 0, 1, 1], [], []>} : vector<16x32xbf16>, vector<32x64xbf16>, vector<16x64xf32> -> vector<16x64xf32>
    %53 = vector.shape_cast %52 : vector<16x64xf32> to vector<2x8x64xf32>
    %54 = arith.addf %45, %53 : vector<2x8x64xf32>
    %cst_24 = arith.constant 0.000000e+00 : f32
    %55 = vector.broadcast %cst_24 : f32 to vector<2x8x64xf32>
    %56 = arith.maximumf %54, %55 : vector<2x8x64xf32>
    %57 = arith.truncf %56 : vector<2x8x64xf32> to vector<2x8x64xbf16>
    %58 = vector.shape_cast %57 : vector<2x8x64xbf16> to vector<16x64xbf16>
    %c1_25 = arith.constant 1 : index
    %c0_26 = arith.constant 0 : index
    %c0_27 = arith.constant 0 : index
    %59 = vector.load %arg6[%c1_25, %c0_26, %c0_27] : memref<3x64x32xbf16, #tpu.memory_space<vmem>>, vector<1x64x32xbf16>
    %60 = vector.shape_cast %59 : vector<1x64x32xbf16> to vector<64x32xbf16>
    %cst_28 = arith.constant dense<0.000000e+00> : vector<16x32xf32>
    %61 = tpu.matmul %58, %60, %cst_28 {dimension_numbers = #tpu.dot_dimension_numbers<[1], [0], [0], [1], [0, 0, 1, 1], [], []>} : vector<16x64xbf16>, vector<64x32xbf16>, vector<16x32xf32> -> vector<16x32xf32>
    %62 = vector.shape_cast %61 : vector<16x32xf32> to vector<2x8x32xf32>
    %c0_29 = arith.constant 0 : index
    %c0_30 = arith.constant 0 : index
    %63 = vector.load %arg7[%c0_29, %c0_30] : memref<1x32xf32, #tpu.memory_space<vmem>>, vector<1x32xf32>
    %64 = vector.shape_cast %63 : vector<1x32xf32> to vector<1x1x32xf32>
    %65 = vector.broadcast %64 : vector<1x1x32xf32> to vector<2x8x32xf32>
    %66 = arith.addf %62, %65 : vector<2x8x32xf32>
    %cst_31 = arith.constant 0.000000e+00 : bf16
    %67 = vector.broadcast %cst_31 : bf16 to vector<1x8x64xbf16>
    %68 = vector.extract_strided_slice %57 {offsets = [0, 0, 0], sizes = [1, 8, 64], strides = [1, 1, 1]} : vector<2x8x64xbf16> to vector<1x8x64xbf16>
    %69 = tpu.concatenate %67, %68 in 0 : vector<1x8x64xbf16>, vector<1x8x64xbf16> -> vector<2x8x64xbf16>
    %70 = vector.shape_cast %69 : vector<2x8x64xbf16> to vector<16x64xbf16>
    %c0_32 = arith.constant 0 : index
    %c0_33 = arith.constant 0 : index
    %c0_34 = arith.constant 0 : index
    %71 = vector.load %arg6[%c0_32, %c0_33, %c0_34] : memref<3x64x32xbf16, #tpu.memory_space<vmem>>, vector<1x64x32xbf16>
    %72 = vector.shape_cast %71 : vector<1x64x32xbf16> to vector<64x32xbf16>
    %cst_35 = arith.constant dense<0.000000e+00> : vector<16x32xf32>
    %73 = tpu.matmul %70, %72, %cst_35 {dimension_numbers = #tpu.dot_dimension_numbers<[1], [0], [0], [1], [0, 0, 1, 1], [], []>} : vector<16x64xbf16>, vector<64x32xbf16>, vector<16x32xf32> -> vector<16x32xf32>
    %74 = vector.shape_cast %73 : vector<16x32xf32> to vector<2x8x32xf32>
    %75 = arith.addf %66, %74 : vector<2x8x32xf32>
    %76 = vector.extract_strided_slice %57 {offsets = [1, 0, 0], sizes = [1, 8, 64], strides = [1, 1, 1]} : vector<2x8x64xbf16> to vector<1x8x64xbf16>
    %cst_36 = arith.constant 0.000000e+00 : bf16
    %77 = vector.broadcast %cst_36 : bf16 to vector<1x8x64xbf16>
    %78 = tpu.concatenate %76, %77 in 0 : vector<1x8x64xbf16>, vector<1x8x64xbf16> -> vector<2x8x64xbf16>
    %79 = vector.shape_cast %78 : vector<2x8x64xbf16> to vector<16x64xbf16>
    %c2_37 = arith.constant 2 : index
    %c0_38 = arith.constant 0 : index
    %c0_39 = arith.constant 0 : index
    %80 = vector.load %arg6[%c2_37, %c0_38, %c0_39] : memref<3x64x32xbf16, #tpu.memory_space<vmem>>, vector<1x64x32xbf16>
    %81 = vector.shape_cast %80 : vector<1x64x32xbf16> to vector<64x32xbf16>
    %cst_40 = arith.constant dense<0.000000e+00> : vector<16x32xf32>
    %82 = tpu.matmul %79, %81, %cst_40 {dimension_numbers = #tpu.dot_dimension_numbers<[1], [0], [0], [1], [0, 0, 1, 1], [], []>} : vector<16x64xbf16>, vector<64x32xbf16>, vector<16x32xf32> -> vector<16x32xf32>
    %83 = vector.shape_cast %82 : vector<16x32xf32> to vector<2x8x32xf32>
    %84 = arith.addf %75, %83 : vector<2x8x32xf32>
    %85 = arith.addf %84, %0 : vector<2x8x32xf32>
    %c0_41 = arith.constant 0 : index
    %c0_42 = arith.constant 0 : index
    %86 = vector.load %arg8[%c0_41, %c0_42] : memref<1x32xf32, #tpu.memory_space<vmem>>, vector<1x32xf32>
    %c0_43 = arith.constant 0 : index
    %c0_44 = arith.constant 0 : index
    %87 = vector.load %arg9[%c0_43, %c0_44] : memref<1x32xf32, #tpu.memory_space<vmem>>, vector<1x32xf32>
    %cst_45 = arith.constant dense<0.000000e+00> : vector<2x8xf32>
    %88 = vector.multi_reduction <add>, %85, %cst_45 [2] : vector<2x8x32xf32> to vector<2x8xf32>
    %89 = vector.shape_cast %88 : vector<2x8xf32> to vector<2x8x1xf32>
    %cst_46 = arith.constant 3.200000e+01 : f32
    %90 = vector.broadcast %cst_46 : f32 to vector<2x8x1xf32>
    %91 = arith.divf %89, %90 : vector<2x8x1xf32>
    %92 = vector.broadcast %91 : vector<2x8x1xf32> to vector<2x8x32xf32>
    %93 = arith.subf %85, %92 : vector<2x8x32xf32>
    %94 = arith.mulf %93, %93 : vector<2x8x32xf32>
    %cst_47 = arith.constant dense<0.000000e+00> : vector<2x8xf32>
    %95 = vector.multi_reduction <add>, %94, %cst_47 [2] : vector<2x8x32xf32> to vector<2x8xf32>
    %96 = vector.shape_cast %95 : vector<2x8xf32> to vector<2x8x1xf32>
    %cst_48 = arith.constant 3.200000e+01 : f32
    %97 = vector.broadcast %cst_48 : f32 to vector<2x8x1xf32>
    %98 = arith.divf %96, %97 : vector<2x8x1xf32>
    %99 = vector.broadcast %91 : vector<2x8x1xf32> to vector<2x8x32xf32>
    %100 = arith.subf %85, %99 : vector<2x8x32xf32>
    %cst_49 = arith.constant 9.99999974E-6 : f32
    %101 = vector.broadcast %cst_49 : f32 to vector<2x8x1xf32>
    %102 = arith.addf %98, %101 : vector<2x8x1xf32>
    %103 = math.rsqrt %102 : vector<2x8x1xf32>
    %104 = vector.broadcast %103 : vector<2x8x1xf32> to vector<2x8x32xf32>
    %105 = arith.mulf %100, %104 : vector<2x8x32xf32>
    %106 = vector.shape_cast %86 : vector<1x32xf32> to vector<1x1x32xf32>
    %107 = vector.broadcast %106 : vector<1x1x32xf32> to vector<2x8x32xf32>
    %108 = arith.mulf %105, %107 : vector<2x8x32xf32>
    %109 = vector.shape_cast %87 : vector<1x32xf32> to vector<1x1x32xf32>
    %110 = vector.broadcast %109 : vector<1x1x32xf32> to vector<2x8x32xf32>
    %111 = arith.addf %108, %110 : vector<2x8x32xf32>
    %c0_50 = arith.constant 0 : index
    %c0_51 = arith.constant 0 : index
    %c0_52 = arith.constant 0 : index
    %112 = vector.load %arg10[%c0_50, %c0_51, %c0_52] : memref<2x8x32xf32, #tpu.memory_space<vmem>>, vector<2x8x32xf32>
    tpu.vector_store %arg10[%c0_50, %c0_51, %c0_52], %111 {strides = array<i32>} : memref<2x8x32xf32, #tpu.memory_space<vmem>>, vector<2x8x32xf32>,
    return
  }
  func.func @transform_0(%arg0: i32) -> (i32, i32, i32) {
    %c0_i32 = arith.constant 0 : i32
    %c0_i32_0 = arith.constant 0 : i32
    %c0_i32_1 = arith.constant 0 : i32
    return %c0_i32, %arg0, %c0_i32_0 : i32, i32, i32
  }
  func.func @transform_1(%arg0: i32) -> (i32, i32) {
    %c0_i32 = arith.constant 0 : i32
    %c0_i32_0 = arith.constant 0 : i32
    %c0_i32_1 = arith.constant 0 : i32
    return %c0_i32, %c0_i32_0 : i32, i32
  }
  func.func @transform_2(%arg0: i32) -> (i32, i32) {
    %c0_i32 = arith.constant 0 : i32
    %c0_i32_0 = arith.constant 0 : i32
    %c0_i32_1 = arith.constant 0 : i32
    return %c0_i32, %c0_i32_0 : i32, i32
  }
  func.func @transform_3(%arg0: i32) -> (i32, i32, i32) {
    %c0_i32 = arith.constant 0 : i32
    %c0_i32_0 = arith.constant 0 : i32
    %c0_i32_1 = arith.constant 0 : i32
    %c0_i32_2 = arith.constant 0 : i32
    return %c0_i32, %c0_i32_0, %c0_i32_1 : i32, i32, i32
  }
  func.func @transform_4(%arg0: i32) -> (i32, i32) {
    %c0_i32 = arith.constant 0 : i32
    %c0_i32_0 = arith.constant 0 : i32
    %c0_i32_1 = arith.constant 0 : i32
    return %c0_i32, %c0_i32_0 : i32, i32
  }
  func.func @transform_5(%arg0: i32) -> (i32, i32, i32) {
    %c0_i32 = arith.constant 0 : i32
    %c0_i32_0 = arith.constant 0 : i32
    %c0_i32_1 = arith.constant 0 : i32
    %c0_i32_2 = arith.constant 0 : i32
    return %c0_i32, %c0_i32_0, %c0_i32_1 : i32, i32, i32
  }
  func.func @transform_6(%arg0: i32) -> (i32, i32) {
    %c0_i32 = arith.constant 0 : i32
    %c0_i32_0 = arith.constant 0 : i32
    %c0_i32_1 = arith.constant 0 : i32
    return %c0_i32, %c0_i32_0 : i32, i32
  }
  func.func @transform_7(%arg0: i32) -> (i32, i32) {
    %c0_i32 = arith.constant 0 : i32
    %c0_i32_0 = arith.constant 0 : i32
    %c0_i32_1 = arith.constant 0 : i32
    return %c0_i32, %c0_i32_0 : i32, i32
  }
  func.func @transform_8(%arg0: i32) -> (i32, i32) {
    %c0_i32 = arith.constant 0 : i32
    %c0_i32_0 = arith.constant 0 : i32
    %c0_i32_1 = arith.constant 0 : i32
    return %c0_i32, %c0_i32_0 : i32, i32
  }
  func.func @transform_9(%arg0: i32) -> (i32, i32, i32) {
    %c0_i32 = arith.constant 0 : i32
    %c0_i32_0 = arith.constant 0 : i32
    %c0_i32_1 = arith.constant 0 : i32
    return %c0_i32, %arg0, %c0_i32_0 : i32, i32, i32
  }
}

</mosaic_0001>

<bundles_post_ra>
// kernel: conformer_block_forward.4
= control target key start
LH: loop header
LB: loop body
LE: loop exit
PB: predicated region body
PF: predicated region fallthrough
CT: control target
= control target key end

     0   :  { %vm31_vm0 = vcmask 261120   ;;  %v337_v14 = vmov 0.0   ;;  %vm338_vm1 = vmmov 0   ;;  %s450_s0 = inlined_call_operand.vmem [shape: f32[16,32], index: 0, kind: input, shape index: {}]   ;;  %s451_s3 = inlined_call_operand.vmem [shape: bf16[32,128], index: 3, kind: input, shape index: {}]   ;;  %s452_s5 = inlined_call_operand.vmem [shape: bf16[128,32], index: 5, kind: input, shape index: {}]   ;;  %s453_s1 = inlined_call_operand.vmem [shape: f32[1,32], index: 1, kind: input, shape index: {}]   ;;  %s454_s2 = inlined_call_operand.vmem [shape: f32[1,32], index: 2, kind: input, shape index: {}]   ;;  %s455_s4 = inlined_call_operand.vmem [shape: f32[1,128], index: 4, kind: input, shape index: {}]   ;;  %s456_s6 = inlined_call_operand.vmem [shape: f32[1,32], index: 6, kind: input, shape index: {}]   ;;  %s457_s7 = inlined_call_operand.vmem [shape: f32[16,32], index: 7, kind: output, shape index: {}]  }
   0x1   :  { %v382_v0 = vld [vmem:[%s450_s0] sm:$0xff]  ;;  %v387_v1 = vld [vmem:[%s450_s0 + $0x8] sm:$0xff]  ;;  %293 = vmatprep.subr.bf16.mxu0 %v337_v14  ;;  %297 = vmatprep.mubr.msk.bf16.mxu0 %vm338_vm1, %v337_v14  ;;  %v325_v17 = vld [vmem:[%s452_s5 + $0x38] sm:$0xff]  }
   0x2   :  { %v32_v2 = vsel %vm31_vm0, %v382_v0, 0.0  ;;  %v35_v3 = vsel %vm31_vm0, %v387_v1, 0.0  ;;  %v323_v15 = vld [vmem:[%s451_s3 + $0x8] sm:$0xff]   ;;  %301 = vmatprep.subr.bf16.mxu1 %v337_v14  ;;  %317 = vmatprep.mubr.msk.bf16.mxu1 %vm338_vm1, %v337_v14  ;;  %v324_v16 = vld [vmem:[%s451_s3] sm:$0xff]   ;;  %v326_v18 = vld [vmem:[%s452_s5 + $0x30] sm:$0xff]  }
   0x3   :  { %33 = vadd.xlane.f32.xlu0 %v32_v2  ;;  %294 = vmatpush3.bf16.msra.mxu0 %v323_v15  ;;  %v327_v19 = vld [vmem:[%s452_s5 + $0x28] sm:$0xff]   ;;  %v328_v20 = vld [vmem:[%s452_s5 + $0x20] sm:$0xff]   ;;  %v329_v21 = vld [vmem:[%s452_s5 + $0x18] sm:$0xff]  }
   0x4   :  { %295 = vmatprep.subr.bf16.mxu0 %v337_v14  ;;  %302 = vmatpush3.bf16.msra.mxu1 %v325_v17  ;;  %v266_v30 = vld [vmem:[%s453_s1] ss:$0 sm:$0xff]  ;;  %v330_v39 = vld [vmem:[%s452_s5 + $0x10] sm:$0xff]   ;;  %v331_v40 = vld [vmem:[%s452_s5 + $0x8] sm:$0xff]  }
   0x5   :  { %303 = vmatprep.subr.bf16.mxu1 %v337_v14  ;;  %v267_v34 = vld [vmem:[%s454_s2] ss:$0 sm:$0xff] }
   0x6   :  { %v332_v41 = vld [vmem:[%s452_s5] sm:$0xff]  }
   0x7   :  { %36 = vadd.xlane.f32.xlu0 %v35_v3  ;;  %296 = vmatpush3.bf16.msra.mxu0 %v324_v16  ;;  %v268_v42 = vld [vmem:[%s455_s4] ss:$0 sm:$0xff] }
   0x8   :  { %304 = vmatpush3.bf16.msra.mxu1 %v326_v18  ;;  %v272_v52 = vld [vmem:[%s456_s6] ss:$0 sm:$0xff] }
   0x9   :  { %305 = vmatprep.subr.bf16.mxu1 %v337_v14 }
   0xc   :  { %306 = vmatpush3.bf16.msra.mxu1 %v327_v19 }
   0xd   :  { %307 = vmatprep.subr.bf16.mxu1 %v337_v14 }
  0x10   :  { %308 = vmatpush3.bf16.msra.mxu1 %v328_v20 }
  0x11   :  { %309 = vmatprep.subr.bf16.mxu1 %v337_v14 }
  0x14   :  { %310 = vmatpush3.bf16.msra.mxu1 %v329_v21 }
  0x15   :  { %311 = vmatprep.subr.bf16.mxu1 %v337_v14 }
  0x18   :  { %312 = vmatpush3.bf16.msra.mxu1 %v330_v39 }
  0x19   :  { %313 = vmatprep.subr.bf16.mxu1 %v337_v14 }
  0x1c   :  { %314 = vmatpush3.bf16.msra.mxu1 %v331_v40 }
  0x1d   :  { %315 = vmatprep.subr.bf16.mxu1 %v337_v14 }
  0x20   :  { %316 = vmatpush3.bf16.msra.mxu1 %v332_v41 }
  0x8c   :  { %v34_v4 = vpop.xlane.xlu0 %33 }
  0x8d   :  { %v39_v5 = vmul.f32 0.03125, %v34_v4 }
  0x8f   :  { %v41_v6 = vsub.f32 %v382_v0, %v39_v5 }
  0x90   :  { %v37_v7 = vpop.xlane.xlu0 %36 }
  0x91   :  { %v40_v8 = vmul.f32 0.03125, %v37_v7  ;;  %v43_v9 = vmul.f32 %v41_v6, %v41_v6 }
  0x93   :  { %v42_v10 = vsub.f32 %v387_v1, %v40_v8  ;;  %v45_v11 = vsel %vm31_vm0, %v43_v9, 0.0 }
  0x94   :  { %46 = vadd.xlane.f32.xlu1 %v45_v11 }
  0x95   :  { %v44_v12 = vmul.f32 %v42_v10, %v42_v10 }
  0x97   :  { %v48_v13 = vsel %vm31_vm0, %v44_v12, 0.0 }
  0x98   :  { %49 = vadd.xlane.f32.xlu1 %v48_v13 }
 0x11d   :  { %v47_v22 = vpop.xlane.xlu1 %46 }
 0x11e   :  { %v51_v23 = vmul.f32 0.03125, %v47_v22 }
 0x120   :  { %v53_v24 = vadd.f32 1e-05, %v51_v23 }
 0x121   :  { %v50_v25 = vpop.xlane.xlu1 %49 }
 0x122   :  { %333 = vrsqrt.f32 %v53_v24  ;;  %v52_v26 = vmul.f32 0.03125, %v50_v25 }
 0x124   :  { %v54_v27 = vadd.f32 1e-05, %v52_v26 }
 0x126   :  { %335 = vrsqrt.f32 %v54_v27 }
 0x12f   :  { %v334_v28 = vpop.eup %333 }
 0x130   :  { %v57_v29 = vmul.f32 %v334_v28, %v41_v6 }
 0x132   :  { %v65_v33 = vmul.f32 %v266_v30, %v57_v29 }
 0x133   :  { %v336_v31 = vpop.eup %335 }
 0x134   :  { %v58_v32 = vmul.f32 %v336_v31, %v42_v10  ;;  %v73_v36 = vadd.f32 %v267_v34, %v65_v33 }
 0x136   :  { %v66_v35 = vmul.f32 %v266_v30, %v58_v32 }
 0x138   :  { %v74_v37 = vadd.f32 %v267_v34, %v66_v35 }
 0x13a   :  { %v75_v38 = vpack.c.bf16 %v74_v37, %v73_v36 }
 0x13c   :  { %298 = vmatmul.mubr.msk.bf16.vlgmr.msra.gmra.mxu0 %vm31_vm0, %v75_v38 }
 0x1fc   :  { %v136_v43 = vpop.f32.mrf.mxu0 }
 0x1fd   :  { %v137_v45 = vadd.f32 %v268_v42, %v136_v43 }
 0x1fe   :  { %v299_v44 = vpop.f32.mrf.mxu0 }
 0x1ff   :  { %v143_v49 = vmax.f32 %v137_v45, 0.0 }
 0x200   :  { %v139_v46 = vpop.f32.mrf.mxu0 }
 0x201   :  { %v140_v47 = vadd.f32 %v268_v42, %v139_v46 }
 0x202   :  { %v300_v48 = vpop.f32.mrf.mxu0 }
 0x203   :  { %v144_v50 = vmax.f32 %v140_v47, 0.0 }
 0x205   :  { %v145_v51 = vpack.c.bf16 %v144_v50, %v143_v49 }
 0x207   :  { %318 = vmatmul.mubr.bf16.vlgmr.msra.gmra.mxu1 %v145_v51 }
 0x2c7   :  { %v251_v53 = vpop.f32.mrf.mxu1 }
 0x2c8   :  { %v252_v54 = vadd.f32 %v272_v52, %v251_v53 }
 0x2c9   :  { %v319_v55 = vpop.f32.mrf.mxu1 }
 0x2ca   :  { %v258_v56 = vadd.f32 %v252_v54, %v382_v0 }
 0x2cb   :  { %v254_v57 = vpop.f32.mrf.mxu1 }
 0x2cc   :  { %260 = vst.msk [vmem:[%s457_s7] sm:$0xff] %vm31_vm0, %v258_v56  ;;  %v255_v58 = vadd.f32 %v272_v52, %v254_v57 }
 0x2cd   :  { %v320_v59 = vpop.f32.mrf.mxu1 }
 0x2ce   :  { %v259_v60 = vadd.f32 %v255_v58, %v387_v1 }
 0x2d0   :  { %261 = vst.msk [vmem:[%s457_s7 + $0x8] sm:$0xff] %vm31_vm0, %v259_v60 }

// kernel: conformer_block_forward.5
= control target key start
LH: loop header
LB: loop body
LE: loop exit
PB: predicated region body
PF: predicated region fallthrough
CT: control target
= control target key end

     0   :  { %vm37_vm0 = vcmask 261120   ;;  %v769_v14 = vmov 0.0   ;;  %vm770_vm1 = vmmov 0   ;;  %v771_v35 = vmov 0   ;;  %s966_s0 = inlined_call_operand.vmem [shape: f32[2,8,32], index: 0, kind: input, shape index: {}]   ;;  %s967_s3 = inlined_call_operand.vmem [shape: bf16[3,32,64], index: 3, kind: input, shape index: {}]   ;;  %s968_s1 = inlined_call_operand.vmem [shape: f32[1,32], index: 1, kind: input, shape index: {}]   ;;  %s969_s2 = inlined_call_operand.vmem [shape: f32[1,32], index: 2, kind: input, shape index: {}]   ;;  %s970_s5 = inlined_call_operand.vmem [shape: bf16[3,64,32], index: 5, kind: input, shape index: {}]   ;;  %s971_s4 = inlined_call_operand.vmem [shape: f32[1,64], index: 4, kind: input, shape index: {}]   ;;  %s972_s6 = inlined_call_operand.vmem [shape: f32[1,32], index: 6, kind: input, shape index: {}]   ;;  %s973_s7 = inlined_call_operand.vmem [shape: f32[1,32], index: 7, kind: input, shape index: {}]   ;;  %s974_s8 = inlined_call_operand.vmem [shape: f32[1,32], index: 8, kind: input, shape index: {}]   ;;  %s975_s9 = inlined_call_operand.vmem [shape: f32[2,8,32], index: 9, kind: output, shape index: {}]  }
   0x1   :  { %v825_v0 = vld [vmem:[%s966_s0] sm:$0xff]  ;;  %v830_v1 = vld [vmem:[%s966_s0 + $0x8] sm:$0xff]  ;;  %688 = vmatprep.subr.bf16.mxu1 %v769_v14  ;;  %680 = vmatprep.subr.bf16.mxu0 %v769_v14  ;;  %v744_v16 = vld [vmem:[%s967_s3 + $0x18] sm:$0xff]   ;;  %vm329_vm2 = vcmask 523264  }
   0x2   :  { %v38_v2 = vsel %vm37_vm0, %v825_v0, 0.0  ;;  %v41_v3 = vsel %vm37_vm0, %v830_v1, 0.0  ;;  %v743_v15 = vld [vmem:[%s967_s3 + $0x8] sm:$0xff]   ;;  %692 = vmatprep.mubr.msk.bf16.mxu1 %vm770_vm1, %v769_v14  ;;  %684 = vmatprep.mubr.msk.bf16.mxu0 %vm770_vm1, %v769_v14  ;;  %v745_v17 = vld [vmem:[%s967_s3] sm:$0xff]   ;;  %v746_v18 = vld [vmem:[%s967_s3 + $0x10] sm:$0xff]  }
   0x3   :  { %39 = vadd.xlane.f32.xlu0 %v38_v2  ;;  %689 = vmatpush3.bf16.msra.mxu1 %v743_v15  ;;  %v594_v26 = vld [vmem:[%s968_s1] ss:$0 sm:$0xff]  ;;  %v747_v38 = vld [vmem:[%s967_s3 + $0x28] sm:$0xff]   ;;  %v749_v43 = vld [vmem:[%s970_s5 + $0x18] sm:$0xff]  }
   0x4   :  { %681 = vmatpush3.bf16.msra.mxu0 %v744_v16  ;;  %690 = vmatprep.subr.bf16.mxu1 %v769_v14  ;;  %v595_v28 = vld [vmem:[%s969_s2] ss:$0 sm:$0xff]  ;;  %v750_v44 = vld [vmem:[%s970_s5 + $0x38] sm:$0xff]   ;;  %v751_v45 = vld [vmem:[%s970_s5 + $0x10] sm:$0xff]  }
   0x5   :  { %682 = vmatprep.subr.bf16.mxu0 %v769_v14  ;;  %v748_v40 = vld [vmem:[%s967_s3 + $0x20] sm:$0xff]   ;;  %v752_v46 = vld [vmem:[%s970_s5 + $0x30] sm:$0xff]   ;;  %v753_v47 = vld [vmem:[%s970_s5 + $0x8] sm:$0xff]  }
   0x6   :  { %v754_v48 = vld [vmem:[%s970_s5 + $0x28] sm:$0xff]   ;;  %v755_v49 = vld [vmem:[%s970_s5] sm:$0xff]   ;;  %v758_v15 = vld [vmem:[%s970_s5 + $0x50] sm:$0xff]  }
   0x7   :  { %42 = vadd.xlane.f32.xlu0 %v41_v3  ;;  %691 = vmatpush3.bf16.msra.mxu1 %v745_v17  ;;  %v756_v50 = vld [vmem:[%s970_s5 + $0x20] sm:$0xff]   ;;  %v759_v16 = vld [vmem:[%s970_s5 + $0x48] sm:$0xff]  }
   0x8   :  { %683 = vmatpush3.bf16.msra.mxu0 %v746_v18  ;;  %704 = vmatprep.subr.bf16.mxu1 %v769_v14  ;;  %v604_v53 = vld [vmem:[%s971_s4] ss:$0 sm:$0xff] }
   0x9   :  { %696 = vmatprep.subr.bf16.mxu0 %v769_v14  ;;  %v760_v17 = vld [vmem:[%s970_s5 + $0x40] sm:$0xff]  }
  0x8c   :  { %v40_v4 = vpop.xlane.xlu0 %39 }
  0x8d   :  { %v45_v5 = vmul.f32 0.03125, %v40_v4 }
  0x8f   :  { %v47_v6 = vsub.f32 %v825_v0, %v45_v5 }
  0x90   :  { %v43_v7 = vpop.xlane.xlu0 %42 }
  0x91   :  { %v46_v8 = vmul.f32 0.03125, %v43_v7  ;;  %v49_v9 = vmul.f32 %v47_v6, %v47_v6 }
  0x93   :  { %v48_v10 = vsub.f32 %v830_v1, %v46_v8  ;;  %v51_v11 = vsel %vm37_vm0, %v49_v9, 0.0 }
  0x94   :  { %52 = vadd.xlane.f32.xlu1 %v51_v11 }
  0x95   :  { %v50_v12 = vmul.f32 %v48_v10, %v48_v10 }
  0x97   :  { %v54_v13 = vsel %vm37_vm0, %v50_v12, 0.0  ;;  %v757_v12 = vld [vmem:[%s970_s5 + $0x58] sm:$0xff]  }
  0x98   :  { %55 = vadd.xlane.f32.xlu1 %v54_v13 }
 0x11d   :  { %v53_v19 = vpop.xlane.xlu1 %52 }
 0x11e   :  { %v57_v20 = vmul.f32 0.03125, %v53_v19 }
 0x120   :  { %v59_v21 = vadd.f32 1e-05, %v57_v20 }
 0x121   :  { %v56_v22 = vpop.xlane.xlu1 %55 }
 0x122   :  { %761 = vrsqrt.f32 %v59_v21  ;;  %v58_v23 = vmul.f32 0.03125, %v56_v22 }
 0x124   :  { %v60_v24 = vadd.f32 1e-05, %v58_v23 }
 0x126   :  { %763 = vrsqrt.f32 %v60_v24 }
 0x12f   :  { %v762_v25 = vpop.eup %761 }
 0x130   :  { %v63_v27 = vmul.f32 %v762_v25, %v47_v6 }
 0x132   :  { %v71_v29 = vmul.f32 %v594_v26, %v63_v27 }
 0x133   :  { %v764_v30 = vpop.eup %763 }
 0x134   :  { %v79_v31 = vadd.f32 %v595_v28, %v71_v29  ;;  %v64_v32 = vmul.f32 %v764_v30, %v48_v10 }
 0x136   :  { %v81_v33 = vpack.c.bf16 %v79_v31, %v79_v31  ;;  %v72_v34 = vmul.f32 %v594_v26, %v64_v32 }
 0x138   :  { %v605_v36 = vcombine.low %v771_v35, %v81_v33  ;;  %v80_v37 = vadd.f32 %v595_v28, %v72_v34  ;;  %v631_v28 = vld [vmem:[%s972_s6] ss:$0 sm:$0xff] }
 0x13a   :  { %693 = vmatmul.mubr.msk.bf16.vlgmr.msra.gmra.mxu1 %vm37_vm0, %v605_v36  ;;  %v654_v39 = vpack.c.bf16 %v80_v37, %v79_v31  ;;  %v82_v41 = vpack.c.bf16 %v80_v37, %v80_v37 }
 0x13b   :  { %712 = vmatprep.mubr.msk.bf16.mxu1 %vm770_vm1, %v769_v14  ;;  %705 = vmatpush3.bf16.msra.mxu1 %v750_v44 }
 0x13c   :  { %685 = vmatmul.mubr.msk.bf16.vlgmr.msra.gmra.mxu0 %vm37_vm0, %v654_v39  ;;  %v613_v42 = vcombine.low %v82_v41, %v771_v35  ;;  %706 = vmatprep.subr.bf16.mxu1 %v769_v14 }
 0x13d   :  { %697 = vmatpush3.bf16.msra.mxu0 %v747_v38  ;;  %700 = vmatprep.mubr.msk.bf16.mxu0 %vm770_vm1, %v769_v14 }
 0x13e   :  { %698 = vmatprep.subr.bf16.mxu0 %v769_v14 }
 0x13f   :  { %707 = vmatpush3.bf16.msra.mxu1 %v752_v46 }
 0x140   :  { %708 = vmatprep.subr.bf16.mxu1 %v769_v14 }
 0x141   :  { %699 = vmatpush3.bf16.msra.mxu0 %v748_v40 }
 0x142   :  { %716 = vmatprep.subr.bf16.mxu0 %v769_v14 }
 0x143   :  { %709 = vmatpush3.bf16.msra.mxu1 %v754_v48 }
 0x144   :  { %701 = vmatmul.mubr.msk.bf16.vlgmr.msra.gmra.mxu0 %vm37_vm0, %v613_v42  ;;  %710 = vmatprep.subr.bf16.mxu1 %v769_v14 }
 0x145   :  { %724 = vmatprep.mubr.msk.bf16.mxu0 %vm770_vm1, %v769_v14  ;;  %717 = vmatpush3.bf16.msra.mxu0 %v749_v43 }
 0x146   :  { %718 = vmatprep.subr.bf16.mxu0 %v769_v14 }
 0x147   :  { %711 = vmatpush3.bf16.msra.mxu1 %v756_v50 }
 0x148   :  { %728 = vmatprep.subr.bf16.mxu1 %v769_v14 }
 0x149   :  { %719 = vmatpush3.bf16.msra.mxu0 %v751_v45 }
 0x14a   :  { %720 = vmatprep.subr.bf16.mxu0 %v769_v14 }
 0x14d   :  { %721 = vmatpush3.bf16.msra.mxu0 %v753_v47 }
 0x14e   :  { %722 = vmatprep.subr.bf16.mxu0 %v769_v14 }
 0x151   :  { %723 = vmatpush3.bf16.msra.mxu0 %v755_v49 }
 0x1fa   :  { %v214_v51 = vpop.f32.mrf.mxu1 }
 0x1fc   :  { %v142_v52 = vpop.f32.mrf.mxu0  ;;  %v694_v54 = vpop.f32.mrf.mxu1 }
 0x1fd   :  { %v156_v57 = vadd.f32 %v604_v53, %v142_v52 }
 0x1fe   :  { %v686_v55 = vpop.f32.mrf.mxu0  ;;  %v217_v56 = vpop.f32.mrf.mxu1 }
 0x1ff   :  { %v221_v62 = vadd.f32 %v214_v51, %v156_v57  ;;  %v652_v57 = vld [vmem:[%s973_s7] ss:$0 sm:$0xff] }
 0x200   :  { %v145_v58 = vpop.f32.mrf.mxu0  ;;  %v695_v59 = vpop.f32.mrf.mxu1 }
 0x201   :  { %v157_v61 = vadd.f32 %v604_v53, %v145_v58  ;;  %v653_v59 = vld [vmem:[%s974_s8] ss:$0 sm:$0xff] }
 0x202   :  { %v687_v60 = vpop.f32.mrf.mxu0 }
 0x203   :  { %v222_v5 = vadd.f32 %v217_v56, %v157_v61 }
 0x204   :  { %v278_v63 = vpop.f32.mrf.mxu0 }
 0x205   :  { %v285_v2 = vadd.f32 %v278_v63, %v221_v62 }
 0x206   :  { %v702_v3 = vpop.f32.mrf.mxu0 }
 0x207   :  { %v287_v4 = vmax.f32 %v285_v2, 0.0 }
 0x208   :  { %v281_v6 = vpop.f32.mrf.mxu0 }
 0x209   :  { %v289_v7 = vpack.c.bf16 %v287_v4, %v287_v4  ;;  %v286_v8 = vadd.f32 %v281_v6, %v222_v5 }
 0x20a   :  { %v703_v9 = vpop.f32.mrf.mxu0 }
 0x20b   :  { %v632_v10 = vcombine.low %v771_v35, %v289_v7  ;;  %v288_v11 = vmax.f32 %v286_v8, 0.0 }
 0x20d   :  { %v655_v13 = vpack.c.bf16 %v288_v11, %v287_v4  ;;  %725 = vmatmul.mubr.msk.bf16.vlgmr.msra.gmra.mxu0 %vm329_vm2, %v632_v10  ;;  %v290_v18 = vpack.c.bf16 %v288_v11, %v288_v11 }
 0x20f   :  { %713 = vmatmul.mubr.msk.bf16.vlgmr.msra.gmra.mxu1 %vm329_vm2, %v655_v13  ;;  %v646_v19 = vcombine.low %v290_v18, %v771_v35 }
 0x210   :  { %729 = vmatpush3.bf16.msra.mxu1 %v757_v12  ;;  %736 = vmatprep.mubr.msk.bf16.mxu1 %vm770_vm1, %v769_v14 }
 0x211   :  { %730 = vmatprep.subr.bf16.mxu1 %v769_v14 }
 0x214   :  { %731 = vmatpush3.bf16.msra.mxu1 %v758_v15 }
 0x215   :  { %732 = vmatprep.subr.bf16.mxu1 %v769_v14 }
 0x218   :  { %733 = vmatpush3.bf16.msra.mxu1 %v759_v16 }
 0x219   :  { %734 = vmatprep.subr.bf16.mxu1 %v769_v14 }
 0x21c   :  { %735 = vmatpush3.bf16.msra.mxu1 %v760_v17 }
 0x21f   :  { %737 = vmatmul.mubr.msk.bf16.vlgmr.msra.gmra.mxu1 %vm329_vm2, %v646_v19 }
 0x2cd   :  { %v453_v20 = vpop.f32.mrf.mxu0 }
 0x2cf   :  { %v367_v21 = vpop.f32.mrf.mxu1  ;;  %v726_v22 = vpop.f32.mrf.mxu0 }
 0x2d0   :  { %v381_v29 = vadd.f32 %v631_v28, %v367_v21 }
 0x2d1   :  { %v714_v23 = vpop.f32.mrf.mxu1  ;;  %v456_v24 = vpop.f32.mrf.mxu0 }
 0x2d2   :  { %v460_v14 = vadd.f32 %v453_v20, %v381_v29 }
 0x2d3   :  { %v370_v25 = vpop.f32.mrf.mxu1  ;;  %v727_v26 = vpop.f32.mrf.mxu0 }
 0x2d4   :  { %v382_v30 = vadd.f32 %v631_v28, %v370_v25 }
 0x2d5   :  { %v715_v27 = vpop.f32.mrf.mxu1 }
 0x2d6   :  { %v461_v34 = vadd.f32 %v456_v24, %v382_v30 }
 0x2df   :  { %v533_v31 = vpop.f32.mrf.mxu1 }
 0x2e0   :  { %v540_v32 = vadd.f32 %v533_v31, %v460_v14 }
 0x2e1   :  { %v738_v33 = vpop.f32.mrf.mxu1 }
 0x2e2   :  { %v542_v35 = vadd.f32 %v540_v32, %v825_v0 }
 0x2e3   :  { %v536_v36 = vpop.f32.mrf.mxu1 }
 0x2e4   :  { %v541_v37 = vadd.f32 %v536_v36, %v461_v34  ;;  %v546_v38 = vsel %vm37_vm0, %v542_v35, 0.0 }
 0x2e5   :  { %v739_v39 = vpop.f32.mrf.mxu1  ;;  %547 = vadd.xlane.f32.xlu0 %v546_v38 }
 0x2e6   :  { %v543_v40 = vadd.f32 %v541_v37, %v830_v1 }
 0x2e8   :  { %v549_v41 = vsel %vm37_vm0, %v543_v40, 0.0 }
 0x2e9   :  { %550 = vadd.xlane.f32.xlu1 %v549_v41 }
 0x36e   :  { %v548_v42 = vpop.xlane.xlu0 %547 }
 0x36f   :  { %v552_v43 = vmul.f32 0.03125, %v548_v42 }
 0x371   :  { %v554_v44 = vsub.f32 %v542_v35, %v552_v43 }
 0x372   :  { %v551_v45 = vpop.xlane.xlu1 %550 }
 0x373   :  { %v553_v46 = vmul.f32 0.03125, %v551_v45  ;;  %v556_v47 = vmul.f32 %v554_v44, %v554_v44 }
 0x375   :  { %v555_v48 = vsub.f32 %v543_v40, %v553_v46  ;;  %v558_v0 = vsel %vm37_vm0, %v556_v47, 0.0 }
 0x376   :  { %559 = vadd.xlane.f32.xlu0 %v558_v0 }
 0x377   :  { %v557_v49 = vmul.f32 %v555_v48, %v555_v48 }
 0x379   :  { %v561_v50 = vsel %vm37_vm0, %v557_v49, 0.0 }
 0x37a   :  { %562 = vadd.xlane.f32.xlu1 %v561_v50 }
 0x3ff   :  { %v560_v51 = vpop.xlane.xlu0 %559 }
 0x400   :  { %v564_v52 = vmul.f32 0.03125, %v560_v51 }
 0x402   :  { %v566_v1 = vadd.f32 1e-05, %v564_v52 }
 0x403   :  { %v563_v53 = vpop.xlane.xlu1 %562 }
 0x404   :  { %765 = vrsqrt.f32 %v566_v1  ;;  %v565_v54 = vmul.f32 0.03125, %v563_v53 }
 0x406   :  { %v567_v55 = vadd.f32 1e-05, %v565_v54 }
 0x408   :  { %767 = vrsqrt.f32 %v567_v55 }
 0x411   :  { %v766_v56 = vpop.eup %765 }
 0x412   :  { %v570_v58 = vmul.f32 %v766_v56, %v554_v44 }
 0x414   :  { %v578_v60 = vmul.f32 %v652_v57, %v570_v58 }
 0x415   :  { %v768_v61 = vpop.eup %767 }
 0x416   :  { %v586_v62 = vadd.f32 %v653_v59, %v578_v60  ;;  %v571_v63 = vmul.f32 %v768_v61, %v555_v48 }
 0x418   :  { %588 = vst.msk [vmem:[%s975_s9] sm:$0xff] %vm37_vm0, %v586_v62  ;;  %v579_v2 = vmul.f32 %v652_v57, %v571_v63 }
 0x41a   :  { %v587_v3 = vadd.f32 %v653_v59, %v579_v2 }
 0x41c   :  { %589 = vst.msk [vmem:[%s975_s9 + $0x8] sm:$0xff] %vm37_vm0, %v587_v3 }

// kernel: conformer_block_forward.3
= control target key start
LH: loop header
LB: loop body
LE: loop exit
PB: predicated region body
PF: predicated region fallthrough
CT: control target
= control target key end

     0   :  { %15 = vsyncpa [#allocation7], 0  ;;  %s2345_s0 = inlined_call_operand.vmem [shape: f32[2,8,32], index: 0, kind: input, shape index: {}, may-alias: {0,1}]   ;;  %s2346_s1 = inlined_call_operand.vmem [shape: f32[2,8,32], index: 1, kind: input, shape index: {}, may-alias: {0,1}]   ;;  %s2347_s2 = inlined_call_operand.vmem [shape: f32[1,32], index: 2, kind: input, shape index: {}]   ;;  %s2348_s3 = inlined_call_operand.vmem [shape: f32[1,32], index: 3, kind: input, shape index: {}]   ;;  %s2349_s4 = inlined_call_operand.vmem [shape: bf16[32,32], index: 4, kind: input, shape index: {}]   ;;  %s2350_s5 = inlined_call_operand.hbm [shape: f32[1,32], index: 5, kind: input, shape index: {}]   ;;  %s2351_s6 = inlined_call_operand.vmem [shape: bf16[32,64], index: 6, kind: input, shape index: {}]   ;;  %s2352_s7 = inlined_call_operand.hbm [shape: f32[1,64], index: 7, kind: input, shape index: {}]   ;;  %s2353_s8 = inlined_call_operand.vmem [shape: bf16[4,8,32], index: 8, kind: input, shape index: {}]   ;;  %s2354_s9 = inlined_call_operand.hbm [shape: f32[1,32], index: 9, kind: input, shape index: {}]   ;;  %s2355_s10 = inlined_call_operand.vmem [shape: f32[2,8,32], index: 10, kind: output, shape index: {}]  }
   0x1   :  { %16 = vsyncpa [#allocation9], 0  ;;  %s2017_s13 = smov 0   ;;  %s2019_s14 = smov 0  }
   0x2   :  { %s2021_s15 = smov 0  }
   0x3 LB: > { %s1942_s16 = smov [#allocation8]   ;;  %s1555_s18 = sadd.s32 4294967295, %s1940_s15   ;;  %s1940_s15 = sphi %s2021_s15, %s22_s15   ;;  %s1936_s14 = sphi %s2019_s14, %s2361_s14   ;;  %s1932_s13 = sphi %s2017_s13, %s2360_s13  }
   0x4   : > { %s323_s17 = sshll.u32 %s1942_s16, 4  ;;  %p1557_p0 = scmp.ge.s32.totalorder %s1940_s15, 1  ;;  %s324_s17 = int_to_ptr.vmem [resolvable:$true] %s323_s17 }
   0x5   : > { %p287_p1 = scmp.lt.s32.totalorder %s1940_s15, 3  ;;  %p2035_p2 = scmp.eq.s32.totalorder %s1555_s18, 0 }
   0x6   : > { %s34_s21 = sadd.s32 1, %s1936_s14  ;;  %s1943_s24 = smov [#allocation6]  }
   0x7   : > { %p2039_p3 = pnand %p1557_p0, %p287_p1  ;;  %p2052_p6 = scmp.ge.s32.totalorder %s34_s21, 2 }
   0x8   : > { %s309_s25 = sshll.u32 %s1943_s24, 4  ;;  %s1843_s26 = scalar_lea.vmem %s324_s17, 16  ;;  %s310_s25 = int_to_ptr.vmem [resolvable:$true] %s309_s25 }
   0x9   : > { %p1732_p4 = pneg %p2039_p3  ;;  %p1844_p8 = scmp.ne.s32.totalorder %s324_s17, %s1843_s26 }
   0xa   : > { %s1850_s27 = scalar_lea.vmem %s324_s17, 32  ;;  %p1851_p11 = scmp.lt.s32.totalorder %s324_s17, %s324_s17 }
   0xb   : > { %p2048_p5 = pnand %p2035_p2, %p1732_p4  ;;  %p1852_p12 = scmp.lt.s32.totalorder %s1850_s27, %s1843_s26 }
   0xd   : > { %p1834_p7 = pneg %p2048_p5  ;;  %p1853_p13 = por %p1852_p12, %p1851_p11 }
   0xf   : > { %p1846_p9 = pnand %p1844_p8, %p1834_p7 }
  0x11   : > { %p1847_p10 = pneg %p1846_p9 }
  0x13   : > { %p1854_p0 = pnand %p1853_p13, %p1847_p10 }
  0x15   : > { %1857 = shalt.err (!%p1854_p0)
}
  0x16   : > { %1738 = dma.hbm_to_vmem [thread:$0]  (!%p2048_p5), %s2352_s7, 16, %s324_s17, [#allocation9]  }
  0x17   : > { %s2363_s21 = smov (%p2052_p6, %s34_s21), 0  ;;  %s1869_s30 = scalar_lea.vmem %s310_s25, 16 }
  0x18   : > { %p1870_p1 = scmp.ne.s32.totalorder %s310_s25, %s1869_s30  ;;  %s1876_s11 = scalar_lea.vmem %s310_s25, 32 }
  0x19   : > { %p1877_p9 = scmp.lt.s32.totalorder %s310_s25, %s310_s25  ;;  %p1878_p10 = scmp.lt.s32.totalorder %s1876_s11, %s1869_s30 }
  0x1a   : > { %p1872_p4 = pnand %p1870_p1, %p1834_p7 }
  0x1b   : > { %p1879_p11 = por %p1878_p10, %p1877_p9 }
  0x1c   : > { %p1873_p8 = pneg %p1872_p4 }
  0x1e   : > { %p1880_p12 = pnand %p1879_p11, %p1873_p8 }
  0x20   : > { %1883 = shalt.err (!%p1880_p12)
}
  0x21   : > { %1735 = dma.hbm_to_vmem [thread:$0]  (!%p2048_p5), %s2350_s5, 16, %s310_s25, [#allocation7]  }
  0x22   : > { %s1944_s17 = smov [#allocation10]  }
  0x23   : > { %s337_s18 = sshll.u32 %s1944_s17, 4  ;;  %s338_s18 = int_to_ptr.vmem [resolvable:$true] %s337_s18 }
  0x24   : > { %s1895_s23 = scalar_lea.vmem %s338_s18, 16  ;;  %s1902_s24 = scalar_lea.vmem %s338_s18, 32 }
  0x25   : > { %p1896_p6 = scmp.ne.s32.totalorder %s338_s18, %s1895_s23  ;;  %p1903_p1 = scmp.lt.s32.totalorder %s338_s18, %s338_s18 }
  0x26   : > { %p1904_p4 = scmp.lt.s32.totalorder %s1902_s24, %s1895_s23 }
  0x27   : > { %p1898_p13 = pnand %p1896_p6, %p1834_p7 }
  0x28   : > { %p1905_p8 = por %p1904_p4, %p1903_p1 }
  0x29   : > { %p1899_p0 = pneg %p1898_p13 }
  0x2b   : > { %p1906_p9 = pnand %p1905_p8, %p1899_p0 }
  0x2d   : > { %1909 = shalt.err (!%p1906_p9)
}
  0x2e   : > { %1741 = dma.hbm_to_vmem [thread:$0]  (!%p2048_p5), %s2354_s9, 16, %s338_s18, [#allocation9]  }
  0x2f   : > { %367 = sbr.rel (%p2039_p3) target bundleno = 1850 (0x73a), region = 60 }
  0x34   : > { %1923 = dma.done.wait (%p2035_p2), [#allocation7], 16  }
  0x35   : > { %1925 = vsyncadd (%p2035_p2), [#allocation7], 4294967280 }
  0x36   : > { %1927 = dma.done.wait (%p2035_p2), [#allocation9], 32  }
  0x37   : > { %1929 = vsyncadd (%p2035_p2), [#allocation9], 4294967264  ;;  %p418_p7 = scmp.lt.s32.totalorder %s1932_s13, 1  ;;  %vm441_vm0 = vcmask 261120   ;;  %v1945_v0 = vmov 0.0   ;;  %v1803_v15 = vld [vmem:[%s2349_s4 + $0x8] sm:$0xff]  }
  0x38   : > { %543 = vst.msk [vmem:[#allocation5] sm:$0xff] %vm441_vm0, %v1945_v0  ;;  %1632 = vmatprep.subr.bf16.mxu0 %v1945_v0  ;;  %1640 = vmatprep.subr.bf16.mxu1 %v1945_v0  ;;  %v1805_v16 = vld [vmem:[%s2351_s6 + $0x8] sm:$0xff]   ;;  %vm1946_vm1 = vmmov 0   ;;  %v1804_v17 = vld [vmem:[%s2349_s4] sm:$0xff]   ;;  %v1571_v37 = vld [vmem:[#allocation6] ss:$0 sm:$0xff] }
  0x39   : > { %s2365_s13 = smov (!%p418_p7, %s1932_s13), 1  ;;  %1636 = vmatprep.mubr.msk.bf16.mxu0 %vm1946_vm1, %v1945_v0  ;;  %1644 = vmatprep.mubr.msk.bf16.mxu1 %vm1946_vm1, %v1945_v0  ;;  %v1806_v18 = vld [vmem:[%s2351_s6] sm:$0xff]   ;;  %vm538_vm2 = vcmask 257024   ;;  %v1577_v41 = vld [vmem:[#allocation8] ss:$0 sm:$0xff]  ;;  %vm645_vm3 = vcmask 64512  }
  0x3a   : > { %s2102_s20 = sshll.u32 %s2365_s13, 3  ;;  %1633 = vmatpush3.bf16.msra.mxu0 %v1803_v15  ;;  %1641 = vmatpush3.bf16.msra.mxu1 %v1805_v16  ;;  %v1569_v26 = vld [vmem:[%s2347_s2] ss:$0 sm:$0xff]  ;;  %s1948_s28 = smov 104   ;;  %vm540_vm4 = vcmask 31744   ;;  %vm714_vm5 = vcmask 7168  }
  0x3b   : > { %s421_s19 = scalar_lea.vmem %s2345_s0, %s2102_s20  ;;  %s428_s30 = scalar_lea.vmem %s2346_s1, %s2102_s20  ;;  %1634 = vmatprep.subr.bf16.mxu0 %v1945_v0  ;;  %1642 = vmatprep.subr.bf16.mxu1 %v1945_v0  ;;  %v1570_v28 = vld [vmem:[%s2348_s3] ss:$0 sm:$0xff]  ;;  %542 = vst.msk [vmem:[#allocation4] sm:$0xff] %vm540_vm4, %v1945_v0  ;;  %vm853_vm6 = vcmask 15368   ;;  %vm995_vm7 = vcmask 23568   ;;  %vm1137_vm8 = vcmask 31768  }
  0x3c   : > { %v2112_v1 = vld [vmem:[%s421_s19] sm:$0xff]  ;;  %s1947_s19 = smov 120   ;;  %s1949_s29 = smov 112   ;;  %vm730_vm9 = vcmask 1043456   ;;  %vm916_vm10 = vcmask 130112   ;;  %vm1058_vm11 = vcmask 195712  }
  0x3d   : > { %v544_v2 = vld [vmem:[%s428_s30] sm:$0xff]  ;;  %v442_v3 = vsel %vm441_vm0, %v2112_v1, 0.0  ;;  %s1954_s30 = smov 96   ;;  %s1956_s13 = smov 88   ;;  %vm1200_vm12 = vcmask 261312  }
  0x3e   : > { %443 = vadd.xlane.f32.xlu0 %v442_v3  ;;  %v548_v4 = vsel %vm441_vm0, %v544_v2, 0.0  ;;  %1635 = vmatpush3.bf16.msra.mxu0 %v1804_v17  ;;  %s1957_s11 = smov 80   ;;  %s1958_s12 = smov 72  }
  0x3f   : > { %1648 = vmatprep.subr.bf16.mxu0 %v1945_v0  ;;  %1643 = vmatpush3.bf16.msra.mxu1 %v1806_v18  ;;  %s1959_s16 = smov 8   ;;  %s1960_s17 = smov 16  }
  0x40   : > { %1654 = vmatprep.subr.bf16.mxu1 %v1945_v0  ;;  %s1961_s18 = smov 24  }
  0x42   : > { %549 = vadd.xlane.f32.xlu0 %v548_v4 }
  0xc7   : > { %v444_v5 = vpop.xlane.xlu0 %443 }
  0xc8   : > { %v446_v6 = vmul.f32 0.03125, %v444_v5 }
  0xca   : > { %v447_v7 = vsub.f32 %v2112_v1, %v446_v6 }
  0xcb   : > { %v550_v8 = vpop.xlane.xlu0 %549 }
  0xcc   : > { %v552_v9 = vmul.f32 0.03125, %v550_v8  ;;  %v448_v10 = vmul.f32 %v447_v7, %v447_v7  ;;  %v1950_v8 = vmov -inf  }
  0xcd   : > { %541 = vst.msk [vmem:[#allocation3] sm:$0xff] %vm540_vm4, %v1950_v8 }
  0xce   : > { %v553_v11 = vsub.f32 %v544_v2, %v552_v9  ;;  %v449_v12 = vsel %vm441_vm0, %v448_v10, 0.0  ;;  %v1951_v9 = vmov 0  }
  0xcf   : > { %450 = vadd.xlane.f32.xlu1 %v449_v12  ;;  %1792 = vset.pattern.permute.xlu0 %v1951_v9 }
  0xd0   : > { %v554_v13 = vmul.f32 %v553_v11, %v553_v11 }
  0xd2   : > { %v555_v14 = vsel %vm441_vm0, %v554_v13, 0.0 }
  0xd3   : > { %556 = vadd.xlane.f32.xlu1 %v555_v14 }
 0x158   : > { %v451_v19 = vpop.xlane.xlu1 %450 }
 0x159   : > { %v452_v20 = vmul.f32 0.03125, %v451_v19 }
 0x15b   : > { %v453_v21 = vadd.f32 1e-05, %v452_v20  ;;  %v1952_v20 = vmov 1  }
 0x15c   : > { %v557_v22 = vpop.xlane.xlu1 %556  ;;  %1793 = vset.pattern.permute.xlu1 %v1952_v20 }
 0x15d   : > { %1810 = vrsqrt.f32 %v453_v21  ;;  %v558_v23 = vmul.f32 0.03125, %v557_v22 }
 0x15f   : > { %v559_v24 = vadd.f32 1e-05, %v558_v23 }
 0x161   : > { %1812 = vrsqrt.f32 %v559_v24 }
 0x16a   : > { %v1811_v25 = vpop.eup %1810 }
 0x16b   : > { %v455_v27 = vmul.f32 %v1811_v25, %v447_v7  ;;  %v2203_v25 = vld [vmem:[#allocation3] sm:$0xff] }
 0x16d   : > { %v462_v29 = vmul.f32 %v1569_v26, %v455_v27 }
 0x16e   : > { %v1813_v30 = vpop.eup %1812 }
 0x16f   : > { %v469_v31 = vadd.f32 %v1570_v28, %v462_v29  ;;  %v561_v32 = vmul.f32 %v1813_v30, %v553_v11 }
 0x171   : > { %v470_v33 = vpack.c.bf16 %v469_v31, %v469_v31  ;;  %v568_v34 = vmul.f32 %v1569_v26, %v561_v32 }
 0x173   : > { %1637 = vmatmul.mubr.msk.bf16.vlgmr.msra.gmra.mxu0 %vm441_vm0, %v470_v33  ;;  %v575_v35 = vadd.f32 %v1570_v28, %v568_v34  ;;  %v1953_v34 = vmov 2  }
 0x174   : > { %1650 = vmatprep.mubr.msk.bf16.mxu0 %vm1946_vm1, %v1945_v0 }
 0x175   : > { %v576_v36 = vpack.c.bf16 %v575_v35, %v575_v35 }
 0x177   : > { %1645 = vmatmul.mubr.msk.bf16.vlgmr.msra.gmra.mxu1 %vm441_vm0, %v576_v36 }
 0x178   : > { %1656 = vmatprep.mubr.msk.bf16.mxu1 %vm1946_vm1, %v1945_v0 }
 0x233   : > { %v531_v38 = vpop.f32.mrf.mxu0 }
 0x234   : > { %v532_v39 = vadd.f32 %v1571_v37, %v531_v38 }
 0x235   : > { %v1638_v40 = vpop.f32.mrf.mxu0 }
 0x236   : > { %v537_v42 = vpack.c.bf16 %v532_v39, %v532_v39  ;;  %v1955_v39 = vmov 3  }
 0x237   : > { %v534_v43 = vpop.f32.mrf.mxu0  ;;  %v637_v44 = vpop.f32.mrf.mxu1 }
 0x238   : > { %539 = vst.msk [vmem:[#allocation2] sm:$0xf] %vm538_vm2, %v537_v42  ;;  %v638_v45 = vadd.f32 %v1577_v41, %v637_v44 }
 0x239   : > { %v1639_v46 = vpop.f32.mrf.mxu0  ;;  %v1646_v47 = vpop.f32.mrf.mxu1 }
 0x23a   : > { %v2152_v48 = vpack.c.bf16 %v638_v45, %v638_v45 }
 0x23b   : > { %v640_v49 = vpop.f32.mrf.mxu1 }
 0x23c   : > { %783 = vrot.lane.b32.xlu0 %v2152_v48, %s1947_s19  ;;  %v650_v50 = vsel %vm645_vm3, %v2152_v48, 0 }
 0x23d   : > { %v1647_v51 = vpop.f32.mrf.mxu1  ;;  %1649 = vmatpush3.bf16.xpose.msra.mxu0 %v650_v50 }
 0x23e   : > { %1660 = vmatprep.subr.bf16.mxu0 %v1945_v0 }
 0x23f   : > { %v1807_v52 = vld [vmem:[#allocation2] ss:$0 sps:$4 sm:$0xff]  }
 0x240   : > { %1067 = vrot.lane.b32.xlu0 %v2152_v48, %s1948_s28  ;;  %781 = vrot.lane.b32.xlu1 %v1807_v52, %s1947_s19  ;;  %v643_v53 = vld [vmem:[#allocation2] sm:$0xf] }
 0x241   : > { %v1808_v54 = vld [vmem:[#allocation2] ss:$0 sps:$4 sm:$0xff]  }
 0x242   : > { %v1809_v55 = vld [vmem:[#allocation2] ss:$0 sps:$4 sm:$0xff]  }
 0x244   : > { %1651 = vmatmul.mubr.msk.bf16.vlgmr.msra.gmra.mxu0 %vm645_vm3, %v643_v53  ;;  %925 = vrot.lane.b32.xlu1 %v2152_v48, %s1949_s29 }
 0x245   : > { %1662 = vmatprep.mubr.msk.bf16.mxu0 %vm1946_vm1, %v1945_v0 }
 0x248   : > { %923 = vrot.lane.b32.xlu1 %v1808_v54, %s1949_s29 }
 0x24c   : > { %1065 = vrot.lane.b32.xlu1 %v1809_v55, %s1948_s28 }
 0x2ae   : > { %v784_v56 = vpop.permute.xlu0 %783 }
 0x2af   : > { %v789_v57 = vsel %vm645_vm3, %v784_v56, 0 }
 0x2b0   : > { %1661 = vmatpush3.bf16.xpose.msra.mxu0 %v789_v57 }
 0x2b1   : > { %1672 = vmatprep.subr.bf16.mxu0 %v1945_v0 }
 0x2b2   : > { %v782_v58 = vpop.permute.xlu1 %781  ;;  %v1068_v61 = vpop.permute.xlu0 %1067 }
 0x2b3   : > { %v1073_v63 = vsel %vm645_vm3, %v1068_v61, 0 }
 0x2b6   : > { %v926_v59 = vpop.permute.xlu1 %925 }
 0x2b7   : > { %1663 = vmatmul.mubr.msk.bf16.vlgmr.msra.gmra.mxu0 %vm645_vm3, %v782_v58  ;;  %v931_v60 = vsel %vm645_vm3, %v926_v59, 0 }
 0x2b8   : > { %1674 = vmatprep.mubr.msk.bf16.mxu0 %vm1946_vm1, %v1945_v0  ;;  %1673 = vmatpush3.bf16.xpose.msra.mxu0 %v931_v60 }
 0x2b9   : > { %1684 = vmatprep.subr.bf16.mxu0 %v1945_v0 }
 0x2ba   : > { %v924_v62 = vpop.permute.xlu1 %923 }
 0x2be   : > { %v1066_v2 = vpop.permute.xlu1 %1065 }
 0x2bf   : > { %1675 = vmatmul.mubr.msk.bf16.vlgmr.msra.gmra.mxu0 %vm645_vm3, %v924_v62 }
 0x2c0   : > { %1685 = vmatpush3.bf16.xpose.msra.mxu0 %v1073_v63  ;;  %1686 = vmatprep.mubr.msk.bf16.mxu0 %vm1946_vm1, %v1945_v0 }
 0x2c1   : > { %1696 = vmatprep.subr.bf16.mxu0 %v1945_v0 }
 0x2c7   : > { %1687 = vmatmul.mubr.msk.bf16.vlgmr.msra.gmra.mxu0 %vm645_vm3, %v1066_v2 }
 0x2c8   : > { %1698 = vmatprep.mubr.msk.bf16.mxu0 %vm1946_vm1, %v1945_v0 }
 0x304   : > { %v2184_v3 = vpop.f32.mrf.mxu0 }
 0x305   : > { %v693_v4 = vsel %vm645_vm3, %v2184_v3, -inf }
 0x306   : > { %694 = vmax.xlane.f32.xlu0 %v693_v4  ;;  %v1652_v5 = vpop.f32.mrf.mxu0 }
 0x308   : > { %v689_v6 = vpop.f32.mrf.mxu0 }
 0x30a   : > { %v1653_v7 = vpop.f32.mrf.mxu0 }
 0x377   : > { %v2190_v10 = vpop.f32.mrf.mxu0 }
 0x378   : > { %v832_v11 = vsel %vm645_vm3, %v2190_v10, -inf }
 0x379   : > { %833 = vmax.xlane.f32.xlu1 %v832_v11  ;;  %v1664_v12 = vpop.f32.mrf.mxu0 }
 0x37b   : > { %v828_v13 = vpop.f32.mrf.mxu0 }
 0x37d   : > { %v1665_v14 = vpop.f32.mrf.mxu0 }
 0x37f   : > { %v2194_v15 = vpop.f32.mrf.mxu0 }
 0x380   : > { %v974_v16 = vsel %vm645_vm3, %v2194_v15, -inf }
 0x381   : > { %975 = vmax.xlane.f32.xlu0 %v974_v16  ;;  %v1676_v17 = vpop.f32.mrf.mxu0 }
 0x383   : > { %v970_v18 = vpop.f32.mrf.mxu0 }
 0x385   : > { %v1677_v19 = vpop.f32.mrf.mxu0 }
 0x387   : > { %v2199_v21 = vpop.f32.mrf.mxu0 }
 0x388   : > { %v1116_v22 = vsel %vm645_vm3, %v2199_v21, -inf }
 0x389   : > { %1117 = vmax.xlane.f32.xlu0 %v1116_v22  ;;  %v1688_v23 = vpop.f32.mrf.mxu0  ;;  %v708_v22 = vld [vmem:[#allocation4] sm:$0xff] }
 0x38b   : > { %v1112_v24 = vpop.f32.mrf.mxu0 }
 0x38d   : > { %v1689_v26 = vpop.f32.mrf.mxu0 }
 0x38f   : > { %v695_v27 = vpop.xlane.xlu0 %694 }
 0x390   : > { %v2206_v28 = vmax.f32 %v2203_v25, %v695_v27 }
 0x392   : > { %v697_v29 = vsub.f32 %v2203_v25, %v2206_v28  ;;  %776 = vst.msk [vmem:[#allocation3] sm:$0xff] %vm714_vm5, %v2206_v28 }
 0x394   : > { %v698_v11 = vmul.f32 1.442695, %v697_v29 }
 0x399   : > { %v2213_v30 = vld [vmem:[#allocation3] sm:$0xff] }
 0x39f   : > { %702 = vperm.xlu0 %1792, %v2206_v28  }
 0x402   : > { %v834_v31 = vpop.xlane.xlu1 %833 }
 0x403   : > { %v2216_v32 = vmax.f32 %v2213_v30, %v834_v31 }
 0x405   : > { %v836_v33 = vsub.f32 %v2213_v30, %v2216_v32  ;;  %918 = vst.msk [vmem:[#allocation3] sm:$0xff] %vm853_vm6, %v2216_v32  ;;  %841 = vperm.xlu1 %1793, %v2216_v32  }
 0x409   : > { %1794 = vset.pattern.permute.xlu1 %v1953_v34 }
 0x40a   : > { %v976_v35 = vpop.xlane.xlu0 %975 }
 0x40c   : > { %v2224_v36 = vld [vmem:[#allocation3] sm:$0xff] }
 0x40d   : > { %v2227_v37 = vmax.f32 %v2224_v36, %v976_v35 }
 0x40f   : > { %v978_v38 = vsub.f32 %v2224_v36, %v2227_v37  ;;  %1060 = vst.msk [vmem:[#allocation3] sm:$0xff] %vm995_vm7, %v2227_v37  ;;  %983 = vperm.xlu1 %1794, %v2227_v37  }
 0x411   : > { %v979_v13 = vmul.f32 1.442695, %v978_v38 }
 0x412   : > { %v1118_v40 = vpop.xlane.xlu0 %1117 }
 0x413   : > { %725 = vrot.lane.b32.xlu1 %v2152_v48, %s1954_s30 }
 0x414   : > { %1795 = vset.pattern.permute.xlu1 %v1955_v39 }
 0x416   : > { %v2236_v41 = vld [vmem:[#allocation3] sm:$0xff] }
 0x417   : > { %v2239_v42 = vmax.f32 %v2236_v41, %v1118_v40  ;;  %863 = vrot.lane.b32.xlu1 %v2152_v48, %s1956_s13 }
 0x419   : > { %v1120_v43 = vsub.f32 %v2236_v41, %v2239_v42  ;;  %1202 = vst.msk [vmem:[#allocation3] sm:$0xff] %vm1137_vm8, %v2239_v42 }
 0x41a   : > { %v703_v44 = vpop.permute.xlu0 %702 }
 0x41b   : > { %1125 = vperm.xlu1 %1795, %v2239_v42   ;;  %v705_v45 = vsub.f32 %v2184_v3, %v703_v44  ;;  %v1121_v30 = vmul.f32 1.442695, %v1120_v43  ;;  %v716_v44 = vld [vmem:[#allocation5] sm:$0xff] }
 0x41d   : > { %v706_v46 = vmul.f32 1.442695, %v705_v45 }
 0x41f   : > { %1005 = vrot.lane.b32.xlu1 %v2152_v48, %s1957_s11  ;;  %1814 = vpow2.f32 %v706_v46 }
 0x420   : > { %1796 = vset.pattern.permute.xlu1 %v1952_v20 }
 0x423   : > { %1147 = vrot.lane.b32.xlu1 %v2152_v48, %s1958_s12 }
 0x42c   : > { %v1815_v47 = vpop.eup %1814 }
 0x42d   : > { %v710_v49 = vsel %vm645_vm3, %v1815_v47, 0.0  ;;  %v723_v57 = vpack.c.bf16 %v1815_v47, %v1815_v47 }
 0x447   : > { %711 = vadd.xlane.f32.xlu1 %v710_v49 }
 0x480   : > { %v842_v50 = vpop.permute.xlu1 %841 }
 0x481   : > { %v844_v51 = vsub.f32 %v2190_v10, %v842_v50 }
 0x483   : > { %v845_v52 = vmul.f32 1.442695, %v844_v51 }
 0x485   : > { %1816 = vpow2.f32 %v845_v52 }
 0x48a   : > { %v984_v53 = vpop.permute.xlu1 %983 }
 0x48b   : > { %v986_v54 = vsub.f32 %v2194_v15, %v984_v53  ;;  %v837_v15 = vmul.f32 1.442695, %v836_v33 }
 0x48d   : > { %v987_v55 = vmul.f32 1.442695, %v986_v54 }
 0x48e   : > { %v726_v48 = vpop.permute.xlu1 %725 }
 0x48f   : > { %1818 = vpow2.f32 %v987_v55  ;;  %v732_v56 = vsel %vm730_vm9, %v726_v48, 0 }
 0x490   : > { %1655 = vmatpush3.bf16.msra.mxu1 %v732_v56 }
 0x491   : > { %1666 = vmatprep.subr.bf16.mxu1 %v1945_v0 }
 0x492   : > { %v1817_v58 = vpop.eup %1816  ;;  %v864_v59 = vpop.permute.xlu1 %863 }
 0x493   : > { %v869_v60 = vsel %vm730_vm9, %v864_v59, 0  ;;  %1657 = vmatmul.mubr.msk.bf16.vlgmr.msra.gmra.mxu1 %vm645_vm3, %v723_v57  ;;  %v849_v61 = vsel %vm645_vm3, %v1817_v58, 0.0  ;;  %v862_v3 = vpack.c.bf16 %v1817_v58, %v1817_v58 }
 0x494   : > { %850 = vadd.xlane.f32.xlu0 %v849_v61  ;;  %1667 = vmatpush3.bf16.msra.mxu1 %v869_v60 }
 0x495   : > { %1668 = vmatprep.mubr.msk.bf16.mxu1 %vm1946_vm1, %v1945_v0  ;;  %1678 = vmatprep.subr.bf16.mxu1 %v1945_v0 }
 0x496   : > { %v1126_v62 = vpop.permute.xlu1 %1125 }
 0x497   : > { %v1128_v63 = vsub.f32 %v2199_v21, %v1126_v62 }
 0x499   : > { %v1129_v2 = vmul.f32 1.442695, %v1128_v63  ;;  %v1216_v63 = vld [vmem:[%s2353_s8] sm:$0xf] }
 0x49a   : > { %v1006_v4 = vpop.permute.xlu1 %1005 }
 0x49b   : > { %1820 = vpow2.f32 %v1129_v2  ;;  %v1011_v5 = vsel %vm730_vm9, %v1006_v4, 0  ;;  %1669 = vmatmul.mubr.msk.bf16.vlgmr.msra.gmra.mxu1 %vm645_vm3, %v862_v3  ;;  %v1278_v2 = vsel %vm730_vm9, %v1216_v63, 0 }
 0x49c   : > { %v1819_v6 = vpop.eup %1818  ;;  %1679 = vmatpush3.bf16.msra.mxu1 %v1011_v5  ;;  %1680 = vmatprep.mubr.msk.bf16.mxu1 %vm1946_vm1, %v1945_v0  ;;  %1822 = vpow2.f32 %v698_v11 }
 0x49d   : > { %v991_v7 = vsel %vm645_vm3, %v1819_v6, 0.0  ;;  %1690 = vmatprep.subr.bf16.mxu1 %v1945_v0  ;;  %v1004_v10 = vpack.c.bf16 %v1819_v6, %v1819_v6  ;;  %1824 = vpow2.f32 %v979_v13 }
 0x49e   : > { %992 = vadd.xlane.f32.xlu0 %v991_v7  ;;  %v1148_v8 = vpop.permute.xlu1 %1147  ;;  %1826 = vpow2.f32 %v837_v15 }
 0x49f   : > { %v1153_v12 = vsel %vm730_vm9, %v1148_v8, 0  ;;  %1828 = vpow2.f32 %v1121_v30 }
 0x4a3   : > { %1681 = vmatmul.mubr.msk.bf16.vlgmr.msra.gmra.mxu1 %vm645_vm3, %v1004_v10 }
 0x4a4   : > { %1691 = vmatpush3.bf16.msra.mxu1 %v1153_v12  ;;  %1692 = vmatprep.mubr.msk.bf16.mxu1 %vm1946_vm1, %v1945_v0 }
 0x4a5   : > { %1702 = vmatprep.subr.bf16.mxu1 %v1945_v0 }
 0x4a8   : > { %v1821_v14 = vpop.eup %1820 }
 0x4a9   : > { %v1133_v16 = vsel %vm645_vm3, %v1821_v14, 0.0  ;;  %v1146_v17 = vpack.c.bf16 %v1821_v14, %v1821_v14  ;;  %v1823_v18 = vpop.eup %1822 }
 0x4aa   : > { %1134 = vadd.xlane.f32.xlu1 %v1133_v16  ;;  %v1825_v19 = vpop.eup %1824  ;;  %v709_v23 = vmul.f32 %v1823_v18, %v708_v22 }
 0x4ab   : > { %1693 = vmatmul.mubr.msk.bf16.vlgmr.msra.gmra.mxu1 %vm645_vm3, %v1146_v17  ;;  %v1827_v21 = vpop.eup %1826 }
 0x4ac   : > { %1704 = vmatprep.mubr.msk.bf16.mxu1 %vm1946_vm1, %v1945_v0  ;;  %v1829_v35 = vpop.eup %1828  ;;  %1703 = vmatpush3.bf16.msra.mxu1 %v1278_v2 }
 0x4ad   : > { %1714 = vmatprep.subr.bf16.mxu1 %v1945_v0 }
 0x4b4   : > { %719 = vperm.xlu0 %1792, %v1823_v18  }
 0x4b8   : > { %1797 = vset.pattern.permute.xlu0 %v1953_v34 }
 0x4b9   : > { %1000 = vperm.xlu0 %1797, %v1825_v19  }
 0x4bb   : > { %858 = vperm.xlu1 %1796, %v1827_v21  }
 0x4bf   : > { %1798 = vset.pattern.permute.xlu1 %v1955_v39 }
 0x4d0   : > { %v712_v24 = vpop.xlane.xlu1 %711 }
 0x4d1   : > { %v713_v25 = vadd.f32 %v712_v24, %v709_v23 }
 0x4d3   : > { %715 = vst.msk [vmem:[#allocation4] sm:$0xff] %vm714_vm5, %v713_v25 }
 0x4da   : > { %v847_v26 = vld [vmem:[#allocation4] sm:$0xff] }
 0x4db   : > { %v848_v27 = vmul.f32 %v1827_v21, %v847_v26  ;;  %v1597_v21 = vld [vmem:[%s2353_s8 + $0xc] sm:$0xf] }
 0x51d   : > { %v851_v28 = vpop.xlane.xlu0 %850 }
 0x51e   : > { %v852_v29 = vadd.f32 %v851_v28, %v848_v27  ;;  %v1393_v28 = vsel %vm730_vm9, %v1597_v21, 0 }
 0x520   : > { %854 = vst.msk [vmem:[#allocation4] sm:$0xff] %vm853_vm6, %v852_v29 }
 0x527   : > { %v989_v31 = vld [vmem:[#allocation4] sm:$0xff]  ;;  %v993_v33 = vpop.xlane.xlu0 %992 }
 0x528   : > { %v990_v32 = vmul.f32 %v1825_v19, %v989_v31 }
 0x52a   : > { %v994_v34 = vadd.f32 %v993_v33, %v990_v32 }
 0x52c   : > { %996 = vst.msk [vmem:[#allocation4] sm:$0xff] %vm995_vm7, %v994_v34  ;;  %v1595_v34 = vld [vmem:[%s2353_s8 + $0x8] sm:$0xf] }
 0x52f   : > { %v720_v45 = vpop.permute.xlu0 %719 }
 0x530   : > { %v722_v46 = vmul.f32 %v720_v45, %v716_v44 }
 0x533   : > { %v1131_v36 = vld [vmem:[#allocation4] sm:$0xff]  ;;  %v1135_v38 = vpop.xlane.xlu1 %1134 }
 0x534   : > { %v1132_v37 = vmul.f32 %v1829_v35, %v1131_v36  ;;  %v1001_v8 = vpop.permute.xlu0 %1000 }
 0x536   : > { %v1136_v40 = vadd.f32 %v1135_v38, %v1132_v37 }
 0x537   : > { %v859_v4 = vpop.permute.xlu1 %858 }
 0x538   : > { %1138 = vst.msk [vmem:[#allocation4] sm:$0xff] %vm1137_vm8, %v1136_v40 }
 0x53f   : > { %v1207_v51 = vld [vmem:[#allocation4] sm:$0xff] }
 0x540   : > { %1830 = vrcp.f32 %v1207_v51 }
 0x54d   : > { %v1831_v59 = vpop.eup %1830 }
 0x553   : > { %v768_v47 = vpop.f32.mrf.mxu1 }
 0x554   : > { %v774_v41 = vadd.f32 %v768_v47, %v722_v46 }
 0x555   : > { %v1658_v42 = vpop.f32.mrf.mxu1 }
 0x556   : > { %775 = vst.msk [vmem:[#allocation5] sm:$0xff] %vm645_vm3, %v774_v41 }
 0x557   : > { %v771_v43 = vpop.f32.mrf.mxu1 }
 0x559   : > { %v1659_v49 = vpop.f32.mrf.mxu1 }
 0x55b   : > { %v905_v50 = vpop.f32.mrf.mxu1 }
 0x55c   : > { %912 = vrot.lane.b32.xlu1 %v905_v50, %s1959_s16 }
 0x55d   : > { %v1670_v52 = vpop.f32.mrf.mxu1  ;;  %v855_v5 = vld [vmem:[#allocation5] sm:$0xff] }
 0x55e   : > { %v861_v6 = vmul.f32 %v859_v4, %v855_v5 }
 0x55f   : > { %v908_v53 = vpop.f32.mrf.mxu1 }
 0x561   : > { %v1671_v54 = vpop.f32.mrf.mxu1 }
 0x563   : > { %v1047_v55 = vpop.f32.mrf.mxu1 }
 0x564   : > { %1054 = vrot.lane.b32.xlu1 %v1047_v55, %s1960_s17 }
 0x565   : > { %v1682_v48 = vpop.f32.mrf.mxu1 }
 0x567   : > { %v1050_v56 = vpop.f32.mrf.mxu1 }
 0x568   : > { %1142 = vperm.xlu1 %1798, %v1829_v35   ;;  %v1335_v35 = vsel %vm730_vm9, %v1595_v34, 0  ;;  %v1599_v56 = vld [vmem:[#allocation10] ss:$0 sm:$0xff] }
 0x569   : > { %v1683_v57 = vpop.f32.mrf.mxu1 }
 0x56b   : > { %v1189_v58 = vpop.f32.mrf.mxu1 }
 0x56c   : > { %1196 = vrot.lane.b32.xlu0 %v1189_v58, %s1961_s18  ;;  %1799 = vset.pattern.permute.xlu1 %v1952_v20  ;;  %v1592_v20 = vld [vmem:[%s2353_s8 + $0x4] sm:$0xf] }
 0x56d   : > { %v1694_v60 = vpop.f32.mrf.mxu1  ;;  %1218 = vperm.xlu1 %1799, %v1831_v59   ;;  %v1232_v3 = vsel %vm730_vm9, %v1592_v20, 0 }
 0x56e   : > { %1697 = vmatpush3.bf16.msra.mxu0 %v1232_v3 }
 0x56f   : > { %v1192_v61 = vpop.f32.mrf.mxu1  ;;  %1708 = vmatprep.subr.bf16.mxu0 %v1945_v0 }
 0x570   : > { %1321 = vperm.xlu0 %1797, %v1831_v59  }
 0x571   : > { %v1695_v62 = vpop.f32.mrf.mxu1  ;;  %1800 = vset.pattern.permute.xlu1 %v1955_v39 }
 0x572   : > { %1379 = vperm.xlu1 %1800, %v1831_v59  }
 0x574   : > { %1801 = vset.pattern.permute.xlu0 %v1951_v9 }
 0x575   : > { %1211 = vperm.xlu0 %1801, %v1831_v59  }
 0x579   : > { %1802 = vset.pattern.permute.xlu0 %v1955_v39 }
 0x5ce   : > { %v913_v9 = vpop.permute.xlu1 %912 }
 0x5cf   : > { %v915_v7 = vadd.f32 %v913_v9, %v861_v6 }
 0x5d1   : > { %917 = vst.msk [vmem:[#allocation5] sm:$0xff] %vm916_vm10, %v915_v7 }
 0x5d6   : > { %v1055_v12 = vpop.permute.xlu1 %1054 }
 0x5d8   : > { %v997_v10 = vld [vmem:[#allocation5] sm:$0xff] }
 0x5d9   : > { %v1003_v11 = vmul.f32 %v1001_v8, %v997_v10 }
 0x5db   : > { %v1057_v13 = vadd.f32 %v1055_v12, %v1003_v11 }
 0x5dd   : > { %1059 = vst.msk [vmem:[#allocation5] sm:$0xff] %vm1058_vm11, %v1057_v13 }
 0x5de   : > { %v1197_v16 = vpop.permute.xlu0 %1196 }
 0x5e3   : > { %v1143_v39 = vpop.permute.xlu1 %1142 }
 0x5e4   : > { %v1139_v14 = vld [vmem:[#allocation5] sm:$0xff] }
 0x5e5   : > { %v1145_v15 = vmul.f32 %v1143_v39, %v1139_v14 }
 0x5e7   : > { %v1199_v17 = vadd.f32 %v1197_v16, %v1145_v15 }
 0x5e8   : > { %v1219_v18 = vpop.permute.xlu1 %1218 }
 0x5e9   : > { %1201 = vst.msk [vmem:[#allocation5] sm:$0xff] %vm1200_vm12, %v1199_v17 }
 0x5eb   : > { %v1322_v19 = vpop.permute.xlu0 %1321 }
 0x5ed   : > { %v1380_v23 = vpop.permute.xlu1 %1379 }
 0x5f0   : > { %v1206_v22 = vld [vmem:[#allocation5] sm:$0xff]  ;;  %v1212_v24 = vpop.permute.xlu0 %1211 }
 0x5f1   : > { %v1221_v25 = vmul.f32 %v1219_v18, %v1206_v22  ;;  %v1382_v26 = vmul.f32 %v1380_v23, %v1206_v22  ;;  %v1214_v27 = vmul.f32 %v1212_v24, %v1206_v22  ;;  %v1324_v30 = vmul.f32 %v1322_v19, %v1206_v22 }
 0x5f3   : > { %v1222_v29 = vpack.c.bf16 %v1221_v25, %v1221_v25  ;;  %v1383_v31 = vpack.c.bf16 %v1382_v26, %v1382_v26  ;;  %v1215_v32 = vpack.c.bf16 %v1214_v27, %v1214_v27  ;;  %v1325_v33 = vpack.c.bf16 %v1324_v30, %v1324_v30 }
 0x5f5   : > { %1705 = vmatmul.mubr.msk.bf16.vlgmr.msra.gmra.mxu1 %vm645_vm3, %v1215_v32  ;;  %1226 = vrot.lane.b32.xlu1 %v1222_v29, %s1947_s19 }
 0x5f6   : > { %1387 = vrot.lane.b32.xlu0 %v1383_v31, %s1948_s28  ;;  %1715 = vmatpush3.bf16.msra.mxu1 %v1393_v28 }
 0x5f7   : > { %1716 = vmatprep.mubr.msk.bf16.mxu1 %vm1946_vm1, %v1945_v0 }
 0x5f9   : > { %1329 = vrot.lane.b32.xlu1 %v1325_v33, %s1949_s29  ;;  %s432_s29 = scalar_lea.vmem %s2355_s10, %s2102_s20 }
 0x667   : > { %v1227_v36 = vpop.permute.xlu1 %1226 }
 0x668   : > { %v1388_v37 = vpop.permute.xlu0 %1387  ;;  %1699 = vmatmul.mubr.msk.bf16.vlgmr.msra.gmra.mxu0 %vm645_vm3, %v1227_v36 }
 0x669   : > { %1717 = vmatmul.mubr.msk.bf16.vlgmr.msra.gmra.mxu1 %vm645_vm3, %v1388_v37  ;;  %1709 = vmatpush3.bf16.msra.mxu0 %v1335_v35 }
 0x66a   : > { %1710 = vmatprep.mubr.msk.bf16.mxu0 %vm1946_vm1, %v1945_v0 }
 0x66b   : > { %v1330_v38 = vpop.permute.xlu1 %1329 }
 0x670   : > { %1711 = vmatmul.mubr.msk.bf16.vlgmr.msra.gmra.mxu0 %vm645_vm3, %v1330_v38 }
 0x6b5   : > { %v1314_v40 = vpop.f32.mrf.mxu1 }
 0x6b7   : > { %v1706_v44 = vpop.f32.mrf.mxu1 }
 0x6b9   : > { %v1317_v45 = vpop.f32.mrf.mxu1 }
 0x6bb   : > { %v1707_v46 = vpop.f32.mrf.mxu1 }
 0x728   : > { %v1268_v47 = vpop.f32.mrf.mxu0 }
 0x729   : > { %v1429_v41 = vpop.f32.mrf.mxu1  ;;  %v1315_v52 = vadd.f32 %v1314_v40, %v1268_v47 }
 0x72a   : > { %v1700_v42 = vpop.f32.mrf.mxu0 }
 0x72b   : > { %v1718_v43 = vpop.f32.mrf.mxu1 }
 0x72c   : > { %v1271_v49 = vpop.f32.mrf.mxu0 }
 0x72d   : > { %v1432_v50 = vpop.f32.mrf.mxu1 }
 0x72e   : > { %v1701_v51 = vpop.f32.mrf.mxu0 }
 0x72f   : > { %v1719_v53 = vpop.f32.mrf.mxu1 }
 0x730   : > { %v1371_v54 = vpop.f32.mrf.mxu0 }
 0x731   : > { %v1377_v55 = vadd.f32 %v1371_v54, %v1315_v52 }
 0x732   : > { %v1712_v0 = vpop.f32.mrf.mxu0 }
 0x733   : > { %v1435_v48 = vadd.f32 %v1429_v41, %v1377_v55 }
 0x734   : > { %v1374_v57 = vpop.f32.mrf.mxu0 }
 0x735   : > { %v1437_v58 = vadd.f32 %v1435_v48, %v2112_v1 }
 0x736   : > { %v1713_v59 = vpop.f32.mrf.mxu0 }
 0x737   : > { %v1445_v60 = vadd.f32 %v1599_v56, %v1437_v58 }
 0x739   : > { %1446 = vst.msk [vmem:[%s432_s29] sm:$0xff] %vm441_vm0, %v1445_v60 }
 0x73a PF: > { %s22_s15 = sadd.s32 1, %s1940_s15   ;;  %s2360_s13 = smov %s1936_s14 }
 0x73b   : > { %p19_p2 = scmp.ge.s32.totalorder %s22_s15, 4   ;;  %s2361_s14 = smov %s2363_s21 }
 0x73d   :  { %21 = sbr.rel (!%p19_p2) target bundleno = 3 (0x3), region = 117 }
 0x742   :  { %1466 = vsyncpa [#allocation7], 1 }
 0x743   :  { %1468 = vsyncpa [#allocation7 + $0x1], 1 }
 0x744   :  { %1469 = vsyncpa [#allocation9], 1 }

</bundles_post_ra>
